<compile_context>
chip_gen: v7x
topology: tpu7x:2x2x1
jax: 0.10.0
libtpu: 0.0.40
codegen_flags: <defaults>
</compile_context>

<pallas_src>
import functools

import numpy as np
import jax
import jax.numpy as jnp
from jax.experimental import pallas as pl
from jax.experimental.pallas import tpu as pltpu


# --------------------------------------------------------------------------- #
# Kernel
# --------------------------------------------------------------------------- #
def _denoise1_kernel(x_ref, cmask_ref, w1_ref, b1_ref, w2_ref, b2_ref,
                     w3_ref, b3_ref, o_ref, *, Wr, TH, H, LH, LO, slope):
    """Fused conv1(3x3)+lrelu -> conv2(3x3)+lrelu -> conv3(1x1) on one row tile.

    x_ref    : (Cp, LX)     bf16  flattened padded input rows, LX = LH + 2*Wr + 2
    cmask_ref: (1, LH)      f32   resident column-validity mask (lane%Wr in [1,W])
    w1_ref   : (C, 9*Cp)    bf16  conv1 weights, all 9 taps merged into K
    b1_ref   : (C, 1)       f32
    w2_ref   : (C, 9*C)     bf16  conv2 weights, all 9 taps merged into K
    b2_ref   : (C, 1)       f32
    w3_ref   : (Cout, C)    bf16  1x1 conv weights
    b3_ref   : (Cout, 1)    f32
    o_ref    : (Cout, LO)   f32   flattened output rows, LO = TH * Wr
    """
    t = pl.program_id(1)                                        # row-tile index
    x = x_ref[...]                                              # (Cp, LX) bf16

    # ---- conv1: one MXU matmul, K = 9*Cp (all taps merged) ----
    p1 = jnp.concatenate(
        [x[:, dy * Wr + dx: dy * Wr + dx + LH]
         for dy in range(3) for dx in range(3)], axis=0)        # (9*Cp, LH)
    h1 = jnp.dot(w1_ref[...], p1,
                 preferred_element_type=jnp.float32) + b1_ref[...]
    h1 = jnp.where(h1 >= 0.0, h1, slope * h1)                   # LeakyReLU(0.2)

    # ---- conv2 zero padding: zero h1 outside the HxW image. The invalid rows
    #      of this tile form a contiguous flat-lane prefix/suffix, so the row
    #      test needs no div/mod; columns use the resident precomputed mask. ----
    lane = jax.lax.broadcasted_iota(jnp.int32, (1, LH), 1)
    row_lo = jnp.maximum(0, 1 - t * TH) * Wr                    # image row >= 0
    row_hi = (H + 1 - t * TH) * Wr                              # image row <  H
    row_ok = (lane >= row_lo) & (lane < row_hi)
    h1 = jnp.where(row_ok, h1 * cmask_ref[...], 0.0)
    h1b = h1.astype(jnp.bfloat16)

    # ---- conv2: ONE MXU matmul, K = 9*C = 432 (all (dy,dx) taps merged) ----
    p2 = jnp.concatenate(
        [h1b[:, dy * Wr + dx: dy * Wr + dx + LO]
         for dy in range(3) for dx in range(3)], axis=0)        # (9*C, LO)
    h2 = jnp.dot(w2_ref[...], p2,
                 preferred_element_type=jnp.float32) + b2_ref[...]
    h2 = jnp.where(h2 >= 0.0, h2, slope * h2)                   # LeakyReLU(0.2)

    # ---- conv3: 1x1 conv as a (Cout, C) x (C, LO) matmul ----
    out = jnp.dot(w3_ref[...], h2.astype(jnp.bfloat16),
                  preferred_element_type=jnp.float32) + b3_ref[...]
    o_ref[...] = out.astype(o_ref.dtype)


# --------------------------------------------------------------------------- #
# Tiling policy (generation aware)
# --------------------------------------------------------------------------- #
def _cdiv(a, b):
    return (a + b - 1) // b


def _round_up(a, b):
    return _cdiv(a, b) * b


def _vmem_capacity_bytes():
    try:
        info = pltpu.get_tpu_info()
        cap = getattr(info, "vmem_capacity_bytes", None)
        if cap:
            return int(cap)
    except Exception:
        pass
    return 128 * 1024 * 1024


# Conservative per-output-lane working set of the fused kernel (dominated by
# the (432, LO) bf16 conv2 operand plus the f32 h1/h2 tiles), with headroom.
_PER_LANE_VMEM_BYTES = 2048


def _plan_tiling(N, H, W, tile_rows=None):
    """Pick (Wr, TH, vmem_limit): flattened row stride, rows per tile, VMEM cap."""
    vmem = _vmem_capacity_bytes()                      # 64 MiB on v7x, 128 MiB on v5e/v6e
    max_lanes = max(512, min(32 * 1024, (vmem // 2) // _PER_LANE_VMEM_BYTES))
    vmem_limit = int(min(vmem * 3 // 4, 96 * 1024 * 1024))
    Wr0 = W + 4

    if tile_rows is not None:
        th = max(1, min(H, int(tile_rows)))
        nT = _cdiv(H, th)
        Wr = Wr0 if (nT == 1 or (th * Wr0) % 128 == 0) else _round_up(Wr0, 128)
        return Wr, th, vmem_limit

    target_steps = 8                                   # feeds both v7x TCs + the pipeline
    per_image = max(1, _cdiv(target_steps, N))
    th_steps = max(1, _cdiv(H, per_image))

    def th_for(Wr):
        return max(1, min(H, max(1, max_lanes // Wr), th_steps))

    if Wr0 % 128 == 0:                                 # stride already lane aligned
        return Wr0, th_for(Wr0), vmem_limit
    th0 = th_for(Wr0)
    if th0 >= H:                                       # single row tile: no alignment needed
        return Wr0, H, vmem_limit
    Wr = _round_up(Wr0, 128)                           # lane-aligned stride for row tiling
    return Wr, th_for(Wr), vmem_limit


# --------------------------------------------------------------------------- #
# Wrapper
# --------------------------------------------------------------------------- #
def denoise1_forward(x_nchw, params, tile_rows=None):
    """Pallas TPU implementation of Denoise1.forward. Input/output are NCHW."""
    N, Cin, H, W = x_nchw.shape
    w1, b1 = params["w1"], params["b1"]
    w2, b2 = params["w2"], params["b2"]
    w3, b3 = params["w3"], params["b3"]
    C = w1.shape[0]                                    # embed_channels (48)
    Cout = w3.shape[0]                                 # 3
    Cp = 8                                             # input channels padded to 8

    Wr, TH, vmem_limit = _plan_tiling(N, H, W, tile_rows)
    nT = _cdiv(H, TH)
    Hp = nT * TH                                       # padded row count (remainder tile)
    LO = TH * Wr                                       # flattened output length / tile
    LH = LO + 2 * Wr + 2                               # flattened intermediate length
    LX = LH + 2 * Wr + 2                               # flattened input length

    # ---- pre-pack weights to merged-tap (Cout, K) layouts, bf16 for the MXU ----
    w1p = jnp.pad(w1.astype(jnp.float32), ((0, 0), (0, Cp - Cin), (0, 0), (0, 0)))
    w1m = jnp.transpose(w1p, (0, 2, 3, 1)).reshape(C, 9 * Cp).astype(jnp.bfloat16)
    w2m = jnp.transpose(w2, (0, 2, 3, 1)).reshape(C, 9 * C).astype(jnp.bfloat16)
    w3m = w3.reshape(Cout, C).astype(jnp.bfloat16)
    b1c = b1.reshape(C, 1).astype(jnp.float32)
    b2c = b2.reshape(C, 1).astype(jnp.float32)
    b3c = b3.reshape(Cout, 1).astype(jnp.float32)

    # ---- input: bf16 first (halves the pad/gather bytes), channel pad 3->8,
    #      common (row, col) zero padding, then overlapping (TH+4)-row halo
    #      windows flattened with stride Wr so tap shifts are lane offsets.
    #      The 48-channel intermediate never touches HBM. ----
    xb = x_nchw.astype(jnp.bfloat16)
    xp = jnp.pad(xb, ((0, 0), (0, Cp - Cin), (2, Hp - H + 2), (2, Wr - W - 2)))
    row_idx = (np.arange(nT)[:, None] * TH + np.arange(TH + 4)[None, :]).reshape(-1)
    x_tiles = jnp.take(xp, jnp.asarray(row_idx, jnp.int32), axis=2)   # (N,Cp,nT*(TH+4),Wr)
    x_tiles = x_tiles.reshape(N, Cp, nT, (TH + 4) * Wr)
    x_tiles = jnp.transpose(x_tiles, (0, 2, 1, 3))                    # (N,nT,Cp,(TH+4)*Wr)
    x_tiles = jnp.pad(x_tiles, ((0, 0), (0, 0), (0, 0), (0, LX - (TH + 4) * Wr)))

    # ---- resident, tile-independent column-validity mask (lane % Wr in [1, W]) ----
    col = np.arange(LH) % Wr
    cmask = jnp.asarray(((col >= 1) & (col <= W)).astype(np.float32).reshape(1, LH))

    kernel = functools.partial(_denoise1_kernel, Wr=Wr, TH=TH, H=H,
                               LH=LH, LO=LO, slope=0.2)

    out_flat = pl.pallas_call(
        kernel,
        out_shape=jax.ShapeDtypeStruct((N, Cout, Hp * Wr), jnp.float32),
        grid=(N, nT),
        in_specs=[
            pl.BlockSpec((pl.Squeezed(), pl.Squeezed(), Cp, LX),
                         lambda n, t: (n, t, 0, 0)),
            pl.BlockSpec((1, LH), lambda n, t: (0, 0)),
            pl.BlockSpec((C, 9 * Cp), lambda n, t: (0, 0)),
            pl.BlockSpec((C, 1), lambda n, t: (0, 0)),
            pl.BlockSpec((C, 9 * C), lambda n, t: (0, 0)),
            pl.BlockSpec((C, 1), lambda n, t: (0, 0)),
            pl.BlockSpec((Cout, C), lambda n, t: (0, 0)),
            pl.BlockSpec((Cout, 1), lambda n, t: (0, 0)),
        ],
        out_specs=pl.BlockSpec((pl.Squeezed(), Cout, LO), lambda n, t: (n, 0, t)),
        compiler_params=pltpu.CompilerParams(
            dimension_semantics=("parallel", "parallel"),
            vmem_limit_bytes=vmem_limit),
    )(x_tiles, cmask, w1m, b1c, w2m, b2c, w3m, b3c)

    out = out_flat.reshape(N, Cout, Hp, Wr)[:, :, :H, :W]
    return out


# --------------------------------------------------------------------------- #
# Reference & params
# --------------------------------------------------------------------------- #
def denoise1_reference(x_nchw, params):
    """Pure-JAX reference (lax convs, NCHW/OIHW) for correctness checking."""
    dn = ("NCHW", "OIHW", "NCHW")

    def conv(h, w, b, pad):
        y = jax.lax.conv_general_dilated(
            h, w, window_strides=(1, 1), padding=pad, dimension_numbers=dn,
            precision=jax.lax.Precision.HIGHEST)
        return y + b.reshape(1, -1, 1, 1)

    h = conv(x_nchw.astype(jnp.float32), params["w1"], params["b1"],
             [(1, 1), (1, 1)])
    h = jnp.where(h >= 0, h, 0.2 * h)
    h = conv(h, params["w2"], params["b2"], [(1, 1), (1, 1)])
    h = jnp.where(h >= 0, h, 0.2 * h)
    h = conv(h, params["w3"], params["b3"], [(0, 0), (0, 0)])
    return h


def make_params(key, embed_channels=48, in_channels=3, out_channels=3):
    """PyTorch-layout params. Weights ~ N(0, 0.02) like Denoise1.init_weights;
    biases small non-zero values to exercise the bias path."""
    C = embed_channels
    k = jax.random.split(key, 6)
    return {
        "w1": 0.02 * jax.random.normal(k[0], (C, in_channels, 3, 3), jnp.float32),
        "b1": 0.02 * jax.random.normal(k[1], (C,), jnp.float32),
        "w2": 0.02 * jax.random.normal(k[2], (C, C, 3, 3), jnp.float32),
        "b2": 0.02 * jax.random.normal(k[3], (C,), jnp.float32),
        "w3": 0.02 * jax.random.normal(k[4], (out_channels, C, 1, 1), jnp.float32),
        "b3": 0.02 * jax.random.normal(k[5], (out_channels,), jnp.float32),
    }


if __name__ == "__main__":
    key = jax.random.PRNGKey(0)
    kp, kx1, kx2, kx3 = jax.random.split(key, 4)
    params = make_params(kp, embed_channels=48)

    # Case 1: small square image; the planner row-tiles it with a lane-aligned
    # (128) stride so both v7x TensorCores get work.
    x1 = jax.random.normal(kx1, (2, 3, 16, 16), jnp.float32)
    out1 = jax.block_until_ready(jax.jit(denoise1_forward)(x1, params))
    assert out1.shape == (2, 3, 16, 16), out1.shape
    ref1 = jax.block_until_ready(denoise1_reference(x1, params))
    err1 = float(jnp.max(jnp.abs(out1 - ref1)))
    assert err1 < 5e-3, f"case1 max abs error {err1}"

    # Case 2: W + 4 already a multiple of 128 -> multi-tile without extra
    # column padding; exercises the halo recompute across row tiles.
    x2 = jax.random.normal(kx2, (2, 3, 16, 124), jnp.float32)
    out2 = jax.block_until_ready(jax.jit(denoise1_forward)(x2, params))
    assert out2.shape == (2, 3, 16, 124), out2.shape
    ref2 = jax.block_until_ready(denoise1_reference(x2, params))
    err2 = float(jnp.max(jnp.abs(out2 - ref2)))
    assert err2 < 5e-3, f"case2 max abs error {err2}"

    # Case 3: H not divisible by the tile rows -> remainder row tile handled by
    # the in-kernel row mask + output slicing (explicit tile_rows override).
    x3 = jax.random.normal(kx3, (1, 3, 11, 56), jnp.float32)
    fwd3 = jax.jit(functools.partial(denoise1_forward, tile_rows=4))
    out3 = jax.block_until_ready(fwd3(x3, params))
    assert out3.shape == (1, 3, 11, 56), out3.shape
    ref3 = jax.block_until_ready(denoise1_reference(x3, params))
    err3 = float(jnp.max(jnp.abs(out3 - ref3)))
    assert err3 < 5e-3, f"case3 max abs error {err3}"

    print("KERNEL_OK")
</pallas_src>

<mosaic_0001>
module attributes {stable_mosaic.version = 11 : i64} {
  func.func @_denoise1_kernel(%arg0: i32, %arg1: i32, %arg2: memref<1x1x8x1028xbf16, #tpu.memory_space<vmem>>, %arg3: memref<1x770xf32, #tpu.memory_space<vmem>>, %arg4: memref<48x72xbf16, #tpu.memory_space<vmem>>, %arg5: memref<48x1xf32, #tpu.memory_space<vmem>>, %arg6: memref<48x432xbf16, #tpu.memory_space<vmem>>, %arg7: memref<48x1xf32, #tpu.memory_space<vmem>>, %arg8: memref<3x48xbf16, #tpu.memory_space<vmem>>, %arg9: memref<3x1xf32, #tpu.memory_space<vmem>>, %arg10: memref<1x3x512xf32, #tpu.memory_space<vmem>>) attributes {dimension_semantics = [#tpu.dimension_semantics<parallel>, #tpu.dimension_semantics<parallel>], iteration_bounds = array<i64: 2, 4>, scalar_prefetch = 0 : i64, scratch_operands = 0 : i64, tpu.core_type = #tpu.core_type<tc>, window_params = [{transform_indices = @transform_0, window_bounds = array<i64: 1, 1, 8, 1028>}, {pipeline_mode = #tpu.pipeline_mode<synchronous>, transform_indices = @transform_1, window_bounds = array<i64: 1, 770>}, {pipeline_mode = #tpu.pipeline_mode<synchronous>, transform_indices = @transform_2, window_bounds = array<i64: 48, 72>}, {pipeline_mode = #tpu.pipeline_mode<synchronous>, transform_indices = @transform_3, window_bounds = array<i64: 48, 1>}, {pipeline_mode = #tpu.pipeline_mode<synchronous>, transform_indices = @transform_4, window_bounds = array<i64: 48, 432>}, {pipeline_mode = #tpu.pipeline_mode<synchronous>, transform_indices = @transform_5, window_bounds = array<i64: 48, 1>}, {pipeline_mode = #tpu.pipeline_mode<synchronous>, transform_indices = @transform_6, window_bounds = array<i64: 3, 48>}, {pipeline_mode = #tpu.pipeline_mode<synchronous>, transform_indices = @transform_7, window_bounds = array<i64: 3, 1>}, {transform_indices = @transform_8, window_bounds = array<i64: 1, 3, 512>}]} {
    %c0 = arith.constant 0 : index
    %c0_0 = arith.constant 0 : index
    %c0_1 = arith.constant 0 : index
    %c0_2 = arith.constant 0 : index
    %0 = vector.load %arg2[%c0, %c0_0, %c0_1, %c0_2] : memref<1x1x8x1028xbf16, #tpu.memory_space<vmem>>, vector<1x1x8x1028xbf16>
    %1 = vector.shape_cast %0 : vector<1x1x8x1028xbf16> to vector<8x1028xbf16>
    %2 = vector.extract_strided_slice %1 {offsets = [0, 0], sizes = [8, 770], strides = [1, 1]} : vector<8x1028xbf16> to vector<8x770xbf16>
    %3 = vector.extract_strided_slice %1 {offsets = [0, 1], sizes = [8, 770], strides = [1, 1]} : vector<8x1028xbf16> to vector<8x770xbf16>
    %4 = vector.extract_strided_slice %1 {offsets = [0, 2], sizes = [8, 770], strides = [1, 1]} : vector<8x1028xbf16> to vector<8x770xbf16>
    %5 = vector.extract_strided_slice %1 {offsets = [0, 128], sizes = [8, 770], strides = [1, 1]} : vector<8x1028xbf16> to vector<8x770xbf16>
    %6 = vector.extract_strided_slice %1 {offsets = [0, 129], sizes = [8, 770], strides = [1, 1]} : vector<8x1028xbf16> to vector<8x770xbf16>
    %7 = vector.extract_strided_slice %1 {offsets = [0, 130], sizes = [8, 770], strides = [1, 1]} : vector<8x1028xbf16> to vector<8x770xbf16>
    %8 = vector.extract_strided_slice %1 {offsets = [0, 256], sizes = [8, 770], strides = [1, 1]} : vector<8x1028xbf16> to vector<8x770xbf16>
    %9 = vector.extract_strided_slice %1 {offsets = [0, 257], sizes = [8, 770], strides = [1, 1]} : vector<8x1028xbf16> to vector<8x770xbf16>
    %10 = vector.extract_strided_slice %1 {offsets = [0, 258], sizes = [8, 770], strides = [1, 1]} : vector<8x1028xbf16> to vector<8x770xbf16>
    %11 = tpu.concatenate %2, %3, %4, %5, %6, %7, %8, %9, %10 in 0 : vector<8x770xbf16>, vector<8x770xbf16>, vector<8x770xbf16>, vector<8x770xbf16>, vector<8x770xbf16>, vector<8x770xbf16>, vector<8x770xbf16>, vector<8x770xbf16>, vector<8x770xbf16> -> vector<72x770xbf16>
    %c0_3 = arith.constant 0 : index
    %c0_4 = arith.constant 0 : index
    %12 = vector.load %arg4[%c0_3, %c0_4] : memref<48x72xbf16, #tpu.memory_space<vmem>>, vector<48x72xbf16>
    %cst = arith.constant dense<0.000000e+00> : vector<48x770xf32>
    %13 = tpu.matmul %12, %11, %cst {dimension_numbers = #tpu.dot_dimension_numbers<[1], [0], [0], [1], [0, 0, 1, 1], [], []>} : vector<48x72xbf16>, vector<72x770xbf16>, vector<48x770xf32> -> vector<48x770xf32>
    %c0_5 = arith.constant 0 : index
    %c0_6 = arith.constant 0 : index
    %14 = vector.load %arg5[%c0_5, %c0_6] : memref<48x1xf32, #tpu.memory_space<vmem>>, vector<48x1xf32>
    %15 = vector.broadcast %14 : vector<48x1xf32> to vector<48x770xf32>
    %16 = arith.addf %13, %15 : vector<48x770xf32>
    %cst_7 = arith.constant 0.000000e+00 : f32
    %17 = vector.broadcast %cst_7 : f32 to vector<48x770xf32>
    %18 = arith.cmpf oge, %16, %17 : vector<48x770xf32>
    %cst_8 = arith.constant 2.000000e-01 : f32
    %19 = vector.broadcast %cst_8 : f32 to vector<48x770xf32>
    %20 = arith.mulf %19, %16 : vector<48x770xf32>
    %21 = arith.select %18, %16, %20 : vector<48x770xi1>, vector<48x770xf32>
    %22 = tpu.iota {dimensions = array<i32: 1>} : vector<1x770xi32>
    %c4_i32 = arith.constant 4 : i32
    %23 = arith.muli %arg1, %c4_i32 : i32
    %c1_i32 = arith.constant 1 : i32
    %24 = arith.subi %c1_i32, %23 : i32
    %c0_i32 = arith.constant 0 : i32
    %25 = arith.maxsi %c0_i32, %24 : i32
    %c128_i32 = arith.constant 128 : i32
    %26 = arith.muli %25, %c128_i32 : i32
    %c4_i32_9 = arith.constant 4 : i32
    %27 = arith.muli %arg1, %c4_i32_9 : i32
    %c17_i32 = arith.constant 17 : i32
    %28 = arith.subi %c17_i32, %27 : i32
    %c128_i32_10 = arith.constant 128 : i32
    %29 = arith.muli %28, %c128_i32_10 : i32
    %30 = vector.broadcast %26 : i32 to vector<1x770xi32>
    %31 = arith.cmpi sge, %22, %30 : vector<1x770xi32>
    %32 = vector.broadcast %29 : i32 to vector<1x770xi32>
    %33 = arith.cmpi slt, %22, %32 : vector<1x770xi32>
    %34 = arith.andi %31, %33 : vector<1x770xi1>
    %c0_11 = arith.constant 0 : index
    %c0_12 = arith.constant 0 : index
    %35 = vector.load %arg3[%c0_11, %c0_12] : memref<1x770xf32, #tpu.memory_space<vmem>>, vector<1x770xf32>
    %36 = vector.broadcast %35 : vector<1x770xf32> to vector<48x770xf32>
    %37 = arith.mulf %21, %36 : vector<48x770xf32>
    %cst_13 = arith.constant 0.000000e+00 : f32
    %38 = vector.shape_cast %34 : vector<1x770xi1> to vector<1x770xi1>
    %39 = vector.broadcast %38 : vector<1x770xi1> to vector<48x770xi1>
    %40 = vector.broadcast %cst_13 : f32 to vector<48x770xf32>
    %41 = arith.select %39, %37, %40 : vector<48x770xi1>, vector<48x770xf32>
    %42 = arith.truncf %41 : vector<48x770xf32> to vector<48x770xbf16>
    %43 = vector.extract_strided_slice %42 {offsets = [0, 0], sizes = [48, 512], strides = [1, 1]} : vector<48x770xbf16> to vector<48x512xbf16>
    %44 = vector.extract_strided_slice %42 {offsets = [0, 1], sizes = [48, 512], strides = [1, 1]} : vector<48x770xbf16> to vector<48x512xbf16>
    %45 = vector.extract_strided_slice %42 {offsets = [0, 2], sizes = [48, 512], strides = [1, 1]} : vector<48x770xbf16> to vector<48x512xbf16>
    %46 = vector.extract_strided_slice %42 {offsets = [0, 128], sizes = [48, 512], strides = [1, 1]} : vector<48x770xbf16> to vector<48x512xbf16>
    %47 = vector.extract_strided_slice %42 {offsets = [0, 129], sizes = [48, 512], strides = [1, 1]} : vector<48x770xbf16> to vector<48x512xbf16>
    %48 = vector.extract_strided_slice %42 {offsets = [0, 130], sizes = [48, 512], strides = [1, 1]} : vector<48x770xbf16> to vector<48x512xbf16>
    %49 = vector.extract_strided_slice %42 {offsets = [0, 256], sizes = [48, 512], strides = [1, 1]} : vector<48x770xbf16> to vector<48x512xbf16>
    %50 = vector.extract_strided_slice %42 {offsets = [0, 257], sizes = [48, 512], strides = [1, 1]} : vector<48x770xbf16> to vector<48x512xbf16>
    %51 = vector.extract_strided_slice %42 {offsets = [0, 258], sizes = [48, 512], strides = [1, 1]} : vector<48x770xbf16> to vector<48x512xbf16>
    %52 = tpu.concatenate %43, %44, %45, %46, %47, %48, %49, %50, %51 in 0 : vector<48x512xbf16>, vector<48x512xbf16>, vector<48x512xbf16>, vector<48x512xbf16>, vector<48x512xbf16>, vector<48x512xbf16>, vector<48x512xbf16>, vector<48x512xbf16>, vector<48x512xbf16> -> vector<432x512xbf16>
    %c0_14 = arith.constant 0 : index
    %c0_15 = arith.constant 0 : index
    %53 = vector.load %arg6[%c0_14, %c0_15] : memref<48x432xbf16, #tpu.memory_space<vmem>>, vector<48x432xbf16>
    %cst_16 = arith.constant dense<0.000000e+00> : vector<48x512xf32>
    %54 = tpu.matmul %53, %52, %cst_16 {dimension_numbers = #tpu.dot_dimension_numbers<[1], [0], [0], [1], [0, 0, 1, 1], [], []>} : vector<48x432xbf16>, vector<432x512xbf16>, vector<48x512xf32> -> vector<48x512xf32>
    %c0_17 = arith.constant 0 : index
    %c0_18 = arith.constant 0 : index
    %55 = vector.load %arg7[%c0_17, %c0_18] : memref<48x1xf32, #tpu.memory_space<vmem>>, vector<48x1xf32>
    %56 = vector.broadcast %55 : vector<48x1xf32> to vector<48x512xf32>
    %57 = arith.addf %54, %56 : vector<48x512xf32>
    %cst_19 = arith.constant 0.000000e+00 : f32
    %58 = vector.broadcast %cst_19 : f32 to vector<48x512xf32>
    %59 = arith.cmpf oge, %57, %58 : vector<48x512xf32>
    %cst_20 = arith.constant 2.000000e-01 : f32
    %60 = vector.broadcast %cst_20 : f32 to vector<48x512xf32>
    %61 = arith.mulf %60, %57 : vector<48x512xf32>
    %62 = arith.select %59, %57, %61 : vector<48x512xi1>, vector<48x512xf32>
    %c0_21 = arith.constant 0 : index
    %c0_22 = arith.constant 0 : index
    %63 = vector.load %arg8[%c0_21, %c0_22] : memref<3x48xbf16, #tpu.memory_space<vmem>>, vector<3x48xbf16>
    %64 = arith.truncf %62 : vector<48x512xf32> to vector<48x512xbf16>
    %cst_23 = arith.constant dense<0.000000e+00> : vector<3x512xf32>
    %65 = tpu.matmul %63, %64, %cst_23 {dimension_numbers = #tpu.dot_dimension_numbers<[1], [0], [0], [1], [0, 0, 1, 1], [], []>} : vector<3x48xbf16>, vector<48x512xbf16>, vector<3x512xf32> -> vector<3x512xf32>
    %c0_24 = arith.constant 0 : index
    %c0_25 = arith.constant 0 : index
    %66 = vector.load %arg9[%c0_24, %c0_25] : memref<3x1xf32, #tpu.memory_space<vmem>>, vector<3x1xf32>
    %67 = vector.broadcast %66 : vector<3x1xf32> to vector<3x512xf32>
    %68 = arith.addf %65, %67 : vector<3x512xf32>
    %c0_26 = arith.constant 0 : index
    %c0_27 = arith.constant 0 : index
    %c0_28 = arith.constant 0 : index
    %69 = vector.load %arg10[%c0_26, %c0_27, %c0_28] : memref<1x3x512xf32, #tpu.memory_space<vmem>>, vector<1x3x512xf32>
    %70 = vector.shape_cast %69 : vector<1x3x512xf32> to vector<3x512xf32>
    %71 = vector.shape_cast %68 : vector<3x512xf32> to vector<1x3x512xf32>
    tpu.vector_store %arg10[%c0_26, %c0_27, %c0_28], %71 {strides = array<i32>} : memref<1x3x512xf32, #tpu.memory_space<vmem>>, vector<1x3x512xf32>,
    return
  }
  func.func @transform_0(%arg0: i32, %arg1: i32) -> (i32, i32, i32, i32) {
    %c0_i32 = arith.constant 0 : i32
    %c0_i32_0 = arith.constant 0 : i32
    %c0_i32_1 = arith.constant 0 : i32
    return %arg0, %arg1, %c0_i32, %c0_i32_0 : i32, i32, i32, i32
  }
  func.func @transform_1(%arg0: i32, %arg1: i32) -> (i32, i32) {
    %c0_i32 = arith.constant 0 : i32
    %c0_i32_0 = arith.constant 0 : i32
    %c0_i32_1 = arith.constant 0 : i32
    return %c0_i32, %c0_i32_0 : i32, i32
  }
  func.func @transform_2(%arg0: i32, %arg1: i32) -> (i32, i32) {
    %c0_i32 = arith.constant 0 : i32
    %c0_i32_0 = arith.constant 0 : i32
    %c0_i32_1 = arith.constant 0 : i32
    return %c0_i32, %c0_i32_0 : i32, i32
  }
  func.func @transform_3(%arg0: i32, %arg1: i32) -> (i32, i32) {
    %c0_i32 = arith.constant 0 : i32
    %c0_i32_0 = arith.constant 0 : i32
    %c0_i32_1 = arith.constant 0 : i32
    return %c0_i32, %c0_i32_0 : i32, i32
  }
  func.func @transform_4(%arg0: i32, %arg1: i32) -> (i32, i32) {
    %c0_i32 = arith.constant 0 : i32
    %c0_i32_0 = arith.constant 0 : i32
    %c0_i32_1 = arith.constant 0 : i32
    return %c0_i32, %c0_i32_0 : i32, i32
  }
  func.func @transform_5(%arg0: i32, %arg1: i32) -> (i32, i32) {
    %c0_i32 = arith.constant 0 : i32
    %c0_i32_0 = arith.constant 0 : i32
    %c0_i32_1 = arith.constant 0 : i32
    return %c0_i32, %c0_i32_0 : i32, i32
  }
  func.func @transform_6(%arg0: i32, %arg1: i32) -> (i32, i32) {
    %c0_i32 = arith.constant 0 : i32
    %c0_i32_0 = arith.constant 0 : i32
    %c0_i32_1 = arith.constant 0 : i32
    return %c0_i32, %c0_i32_0 : i32, i32
  }
  func.func @transform_7(%arg0: i32, %arg1: i32) -> (i32, i32) {
    %c0_i32 = arith.constant 0 : i32
    %c0_i32_0 = arith.constant 0 : i32
    %c0_i32_1 = arith.constant 0 : i32
    return %c0_i32, %c0_i32_0 : i32, i32
  }
  func.func @transform_8(%arg0: i32, %arg1: i32) -> (i32, i32, i32) {
    %c0_i32 = arith.constant 0 : i32
    %c0_i32_0 = arith.constant 0 : i32
    return %arg0, %c0_i32, %arg1 : i32, i32, i32
  }
}

</mosaic_0001>

<bundles_post_ra>
// kernel: denoise1_forward.1
= control target key start
LH: loop header
LB: loop body
LE: loop exit
PB: predicated region body
PF: predicated region fallthrough
CT: control target
= control target key end

     0   :  { %s4481_s0 = inlined_call_operand.hbm [shape: bf16[2,4,8,1028], index: 0, kind: input, shape index: {}]   ;;  %s4482_s1 = inlined_call_operand.hbm [shape: f32[1,770], index: 1, kind: input, shape index: {}]   ;;  %s4483_s2 = inlined_call_operand.hbm [shape: bf16[48,72], index: 2, kind: input, shape index: {}]   ;;  %s4484_s3 = inlined_call_operand.hbm [shape: f32[48,1], index: 3, kind: input, shape index: {}]   ;;  %s4485_s4 = inlined_call_operand.hbm [shape: bf16[48,432], index: 4, kind: input, shape index: {}]   ;;  %s4486_s5 = inlined_call_operand.hbm [shape: f32[48,1], index: 5, kind: input, shape index: {}]   ;;  %s4487_s6 = inlined_call_operand.hbm [shape: bf16[3,48], index: 6, kind: input, shape index: {}]   ;;  %s4488_s7 = inlined_call_operand.hbm [shape: f32[3,1], index: 7, kind: input, shape index: {}]   ;;  %s4489_s8 = inlined_call_operand.hbm [shape: f32[2,3,2048], index: 8, kind: output, shape index: {}]  }
   0x1   :  { %4512 = sst [smem:[#allocation33_spill]] %s4482_s1 }
   0x2   :  { %4513 = sst [smem:[#allocation34_spill]] %s4483_s2 }
   0x3   :  { %4514 = sst [smem:[#allocation35_spill]] %s4484_s3 }
   0x4   :  { %4515 = sst [smem:[#allocation36_spill]] %s4485_s4 }
   0x5   :  { %4516 = sst [smem:[#allocation37_spill]] %s4486_s5 }
   0x6   :  { %4517 = sst [smem:[#allocation38_spill]] %s4489_s8 }
   0x7   :  { %13 = vsyncpa [#allocation3], 0 }
   0x8   :  { %15 = vsyncpa [#allocation3 + $0x1], 0 }
   0x9   :  { %16 = vsyncpa [#allocation6], 0 }
   0xa   :  { %17 = vsyncpa [#allocation9], 0 }
   0xb   :  { %18 = vsyncpa [#allocation12], 0 }
   0xc   :  { %19 = vsyncpa [#allocation15], 0 }
   0xd   :  { %20 = vsyncpa [#allocation4], 0 }
   0xe   :  { %22 = vsyncpa [#allocation4 + $0x1], 0  ;;  %s3014_s27 = smov 0   ;;  %s3016_s28 = smov 0  }
   0xf   :  { %s3018_s29 = smov 0   ;;  %s3020_s30 = smov 0  }
  0x10   :  { %s3022_s9 = smov 0   ;;  %s3024_s10 = smov 0  }
  0x11   :  { %s3026_s11 = smov 0   ;;  %s3028_s12 = smov 0  }
  0x12 LB: > { %4518 = sst [smem:[#allocation23_spill]] %s2935_s9  ;;  %s4490_s13 = sadd.s32 4294967295, %s2947_s12   ;;  %s2947_s12 = sphi %s3028_s12, %s28_s12   ;;  %s2943_s11 = sphi %s3026_s11, %s4611_s11   ;;  %s2939_s10 = sphi %s3024_s10, %s4610_s10   ;;  %s2935_s9 = sphi %s3022_s9, %s4609_s9   ;;  %s2931_s30 = sphi %s3020_s30, %s4608_s30   ;;  %s2927_s29 = sphi %s3018_s29, %s4607_s29   ;;  %s2923_s28 = sphi %s3016_s28, %s4606_s28   ;;  %s2919_s27 = sphi %s3014_s27, %s4605_s27  }
  0x13   : > { %p2150_p0 = scmp.ge.s32.totalorder %s2947_s12, 1  ;;  %p3058_p1 = scmp.eq.s32.totalorder %s4490_s13, 0 }
  0x14   : > { %p248_p2 = scmp.lt.s32.totalorder %s2947_s12, 9  ;;  %s2949_s16 = smov [#allocation5]  }
  0x15   : > { %s4519_s14 = scalar_select %p3058_p1, 1, 0 }
  0x16   : > { %p3063_p3 = pnand %p2150_p0, %p248_p2  ;;  %s261_s17 = sshll.u32 %s2949_s16, 4  ;;  %s262_s17 = int_to_ptr.vmem [resolvable:$true] %s261_s17 }
  0x17   : > { %s2950_s18 = smov [#allocation8]   ;;  %s2951_s21 = smov [#allocation11]  }
  0x18   : > { %s4520_s15 = scalar_select %p3063_p3, 1, 0 }
  0x19   : > { %p2447_p4 = pneg %p3063_p3  ;;  %s284_s19 = sshll.u32 %s2950_s18, 4  ;;  %s3075_s19 = int_to_ptr.vmem [resolvable:$true] %s284_s19 }
  0x1a   : > { %s3077_s22 = sshll.u32 %s2951_s21, 4  ;;  %s4522_s1 = sld [smem:[#allocation33_spill]]  ;;  %s311_s22 = int_to_ptr.vmem [resolvable:$true] %s3077_s22 }
  0x1b   : > { %p3071_p5 = pnand %p2447_p4, %p3058_p1 }
  0x1d   : > { %p3087_p7 = pneg %p3071_p5 }
  0x20   : > { %s2607_s25 = scalar_lea.hbm %s4522_s1, 112 }
  0x21   : > { %p2608_p6 = scmp.ne.s32.totalorder %s4522_s1, %s2607_s25  ;;  %p2614_p10 = scmp.lt.u32.totalorder %s2607_s25, %s4522_s1 }
  0x23   : > { %p2610_p8 = pnand %p3087_p7, %p2608_p6 }
  0x25   : > { %p2611_p9 = pneg %p2610_p8 }
  0x27   : > { %p2616_p11 = pnand %p2614_p10, %p2611_p9 }
  0x29   : > { %2619 = shalt.err (!%p2616_p11)
}
  0x2a   : > { %s2620_s23 = scalar_lea.vmem %s262_s17, 112  ;;  %s2627_s24 = scalar_lea.vmem %s262_s17, 128 }
  0x2b   : > { %p2621_p12 = scmp.ne.s32.totalorder %s262_s17, %s2620_s23  ;;  %p2628_p2 = scmp.lt.s32.totalorder %s262_s17, %s262_s17 }
  0x2c   : > { %p2629_p4 = scmp.lt.s32.totalorder %s2627_s24, %s2620_s23 }
  0x2d   : > { %p2623_p13 = pnand %p2621_p12, %p3087_p7 }
  0x2e   : > { %p2630_p3 = por %p2629_p4, %p2628_p2 }
  0x2f   : > { %p2624_p0 = pneg %p2623_p13 }
  0x31   : > { %p2631_p1 = pnand %p2630_p3, %p2624_p0 }
  0x33   : > { %2634 = shalt.err (!%p2631_p1)
}
  0x34   : > { %2450 = dma.hbm_to_vmem [thread:$0]  (!%p3071_p5), %s4522_s1, 112, %s262_s17, [#allocation6]  }
  0x35   : > { %s4524_s3 = sld [smem:[#allocation35_spill]] }
  0x3b   : > { %s2635_s21 = scalar_lea.hbm %s4524_s3, 768 }
  0x3c   : > { %p2636_p6 = scmp.ne.s32.totalorder %s4524_s3, %s2635_s21  ;;  %p2642_p1 = scmp.lt.u32.totalorder %s2635_s21, %s4524_s3 }
  0x3e   : > { %p2638_p8 = pnand %p2636_p6, %p3087_p7 }
  0x40   : > { %p2639_p9 = pneg %p2638_p8 }
  0x42   : > { %p2644_p3 = pnand %p2642_p1, %p2639_p9 }
  0x44   : > { %2647 = shalt.err (!%p2644_p3)
}
  0x45   : > { %s2648_s17 = scalar_lea.vmem %s3075_s19, 768  ;;  %p2656_p13 = scmp.lt.s32.totalorder %s3075_s19, %s3075_s19 }
  0x46   : > { %p2649_p10 = scmp.ne.s32.totalorder %s3075_s19, %s2648_s17  ;;  %p2657_p0 = scmp.lt.s32.totalorder %s2648_s17, %s2648_s17 }
  0x48   : > { %p2651_p11 = pnand %p2649_p10, %p3087_p7  ;;  %p2658_p2 = por %p2657_p0, %p2656_p13 }
  0x4a   : > { %p2652_p12 = pneg %p2651_p11 }
  0x4c   : > { %p2659_p4 = pnand %p2658_p2, %p2652_p12 }
  0x4e   : > { %2662 = shalt.err (!%p2659_p4)
}
  0x4f   : > { %s2952_s8 = smov 128   ;;  %s2953_s9 = smov 8  }
  0x50   : > { %2456 = dma.hbm_to_vmem [thread:$0]  (!%p3071_p5), %s4524_s3, 768, %s3075_s19, [#allocation9], %s2952_s8, %s2952_s8, %s2953_s9  }
  0x51   : > { %s4525_s5 = sld [smem:[#allocation37_spill]] }
  0x57   : > { %s2663_s21 = scalar_lea.hbm %s4525_s5, 768 }
  0x58   : > { %p2664_p6 = scmp.ne.s32.totalorder %s4525_s5, %s2663_s21  ;;  %p2670_p1 = scmp.lt.u32.totalorder %s2663_s21, %s4525_s5 }
  0x5a   : > { %p2666_p8 = pnand %p2664_p6, %p3087_p7 }
  0x5c   : > { %p2667_p9 = pneg %p2666_p8 }
  0x5e   : > { %p2672_p3 = pnand %p2670_p1, %p2667_p9 }
  0x60   : > { %2675 = shalt.err (!%p2672_p3)
}
  0x61   : > { %s2676_s26 = scalar_lea.vmem %s311_s22, 768  ;;  %p2684_p13 = scmp.lt.s32.totalorder %s311_s22, %s311_s22 }
  0x62   : > { %p2677_p10 = scmp.ne.s32.totalorder %s311_s22, %s2676_s26  ;;  %p2685_p0 = scmp.lt.s32.totalorder %s2676_s26, %s2676_s26 }
  0x64   : > { %p2679_p11 = pnand %p2677_p10, %p3087_p7  ;;  %p2686_p2 = por %p2685_p0, %p2684_p13 }
  0x66   : > { %p2680_p12 = pneg %p2679_p11 }
  0x68   : > { %p2687_p4 = pnand %p2686_p2, %p2680_p12 }
  0x6a   : > { %2690 = shalt.err (!%p2687_p4)
}
  0x6b   : > { %2462 = dma.hbm_to_vmem [thread:$0]  (!%p3071_p5), %s4525_s5, 768, %s311_s22, [#allocation12], %s2952_s8, %s2952_s8, %s2953_s9  }
  0x6c   : > { %s2954_s1 = smov [#allocation7]   ;;  %s4526_s2 = sld [smem:[#allocation34_spill]] }
  0x6d   : > { %s271_s13 = sshll.u32 %s2954_s1, 4  ;;  %s272_s13 = int_to_ptr.vmem [resolvable:$true] %s271_s13 }
  0x72   : > { %s2691_s23 = scalar_lea.hbm %s4526_s2, 384 }
  0x73   : > { %p2692_p6 = scmp.ne.s32.totalorder %s4526_s2, %s2691_s23  ;;  %p2698_p1 = scmp.lt.u32.totalorder %s2691_s23, %s4526_s2 }
  0x75   : > { %p2694_p8 = pnand %p2692_p6, %p3087_p7 }
  0x77   : > { %p2695_p9 = pneg %p2694_p8 }
  0x79   : > { %p2700_p3 = pnand %p2698_p1, %p2695_p9 }
  0x7b   : > { %2703 = shalt.err (!%p2700_p3)
}
  0x7c   : > { %s2704_s22 = scalar_lea.vmem %s272_s13, 384  ;;  %p2712_p13 = scmp.lt.s32.totalorder %s272_s13, %s272_s13 }
  0x7d   : > { %p2705_p10 = scmp.ne.s32.totalorder %s272_s13, %s2704_s22  ;;  %p2713_p0 = scmp.lt.s32.totalorder %s2704_s22, %s2704_s22 }
  0x7f   : > { %p2707_p11 = pnand %p2705_p10, %p3087_p7  ;;  %p2714_p2 = por %p2713_p0, %p2712_p13 }
  0x81   : > { %p2708_p12 = pneg %p2707_p11 }
  0x83   : > { %p2715_p4 = pnand %p2714_p2, %p2708_p12 }
  0x85   : > { %2718 = shalt.err (!%p2715_p4)
}
  0x86   : > { %s2955_s8 = smov 64   ;;  %s2956_s9 = smov 4  }
  0x87   : > { %2453 = dma.hbm_to_vmem [thread:$0]  (!%p3071_p5), %s4526_s2, 384, %s272_s13, [#allocation6], %s2955_s8, %s2955_s8, %s2956_s9  }
  0x88   : > { %s2957_s16 = smov [#allocation10]   ;;  %s4527_s4 = sld [smem:[#allocation36_spill]] }
  0x89   : > { %s297_s1 = sshll.u32 %s2957_s16, 4  ;;  %s298_s1 = int_to_ptr.vmem [resolvable:$true] %s297_s1 }
  0x8e   : > { %s2719_s23 = scalar_lea.hbm %s4527_s4, 1536 }
  0x8f   : > { %p2720_p6 = scmp.ne.s32.totalorder %s4527_s4, %s2719_s23  ;;  %p2726_p1 = scmp.lt.u32.totalorder %s2719_s23, %s4527_s4 }
  0x91   : > { %p2722_p8 = pnand %p2720_p6, %p3087_p7 }
  0x93   : > { %p2723_p9 = pneg %p2722_p8 }
  0x95   : > { %p2728_p3 = pnand %p2726_p1, %p2723_p9 }
  0x97   : > { %2731 = shalt.err (!%p2728_p3)
}
  0x98   : > { %s2732_s13 = scalar_lea.vmem %s298_s1, 1536  ;;  %p2740_p13 = scmp.lt.s32.totalorder %s298_s1, %s298_s1 }
  0x99   : > { %p2733_p10 = scmp.ne.s32.totalorder %s298_s1, %s2732_s13  ;;  %p2741_p0 = scmp.lt.s32.totalorder %s2732_s13, %s2732_s13 }
  0x9b   : > { %p2735_p11 = pnand %p2733_p10, %p3087_p7  ;;  %p2742_p2 = por %p2741_p0, %p2740_p13 }
  0x9d   : > { %p2736_p12 = pneg %p2735_p11 }
  0x9f   : > { %p2743_p4 = pnand %p2742_p2, %p2736_p12 }
  0xa1   : > { %2746 = shalt.err (!%p2743_p4)
}
  0xa2   : > { %s2958_s8 = smov 256   ;;  %s2959_s9 = smov 16  }
  0xa3   : > { %2459 = dma.hbm_to_vmem [thread:$0]  (!%p3071_p5), %s4527_s4, 1536, %s298_s1, [#allocation9], %s2958_s8, %s2958_s8, %s2959_s9  }
  0xa4   : > { %s2960_s16 = smov [#allocation13]   ;;  %s2961_s21 = smov [#allocation14]  }
  0xa5   : > { %s324_s25 = sshll.u32 %s2960_s16, 4  ;;  %s335_s23 = sshll.u32 %s2961_s21, 4  ;;  %s325_s25 = int_to_ptr.vmem [resolvable:$true] %s324_s25  ;;  %s336_s23 = int_to_ptr.vmem [resolvable:$true] %s335_s23 }
  0xa6   : > { %s2747_s26 = scalar_lea.hbm %s4487_s6, 32 }
  0xa7   : > { %p2748_p6 = scmp.ne.s32.totalorder %s4487_s6, %s2747_s26  ;;  %p2754_p1 = scmp.lt.u32.totalorder %s2747_s26, %s4487_s6 }
  0xa9   : > { %p2750_p8 = pnand %p2748_p6, %p3087_p7 }
  0xab   : > { %p2751_p9 = pneg %p2750_p8 }
  0xad   : > { %p2756_p3 = pnand %p2754_p1, %p2751_p9 }
  0xaf   : > { %2759 = shalt.err (!%p2756_p3)
}
  0xb0   : > { %s2760_s1 = scalar_lea.vmem %s325_s25, 32  ;;  %p2768_p13 = scmp.lt.s32.totalorder %s325_s25, %s325_s25 }
  0xb1   : > { %p2761_p10 = scmp.ne.s32.totalorder %s325_s25, %s2760_s1  ;;  %p2769_p0 = scmp.lt.s32.totalorder %s2760_s1, %s2760_s1 }
  0xb3   : > { %p2763_p11 = pnand %p2761_p10, %p3087_p7  ;;  %p2770_p2 = por %p2769_p0, %p2768_p13 }
  0xb5   : > { %p2764_p12 = pneg %p2763_p11 }
  0xb7   : > { %p2771_p4 = pnand %p2770_p2, %p2764_p12 }
  0xb9   : > { %2774 = shalt.err (!%p2771_p4)
}
  0xba   : > { %2465 = dma.hbm_to_vmem [thread:$0]  (!%p3071_p5), %s4487_s6, 32, %s325_s25, [#allocation12]  }
  0xbb   : > { %s2775_s3 = scalar_lea.hbm %s4488_s7, 64 }
  0xbc   : > { %p2776_p6 = scmp.ne.s32.totalorder %s4488_s7, %s2775_s3  ;;  %p2782_p1 = scmp.lt.u32.totalorder %s2775_s3, %s4488_s7 }
  0xbe   : > { %p2778_p8 = pnand %p2776_p6, %p3087_p7 }
  0xc0   : > { %p2779_p9 = pneg %p2778_p8 }
  0xc2   : > { %p2784_p3 = pnand %p2782_p1, %p2779_p9 }
  0xc4   : > { %2787 = shalt.err (!%p2784_p3)
}
  0xc5   : > { %s2788_s17 = scalar_lea.vmem %s336_s23, 64  ;;  %p2796_p13 = scmp.lt.s32.totalorder %s336_s23, %s336_s23 }
  0xc6   : > { %p2789_p10 = scmp.ne.s32.totalorder %s336_s23, %s2788_s17  ;;  %p2797_p0 = scmp.lt.s32.totalorder %s2788_s17, %s2788_s17 }
  0xc8   : > { %p2791_p11 = pnand %p2789_p10, %p3087_p7  ;;  %p2798_p2 = por %p2797_p0, %p2796_p13 }
  0xca   : > { %p2792_p12 = pneg %p2791_p11 }
  0xcc   : > { %p2799_p4 = pnand %p2798_p2, %p2792_p12 }
  0xce   : > { %2802 = shalt.err (!%p2799_p4)
}
  0xcf   : > { %2468 = dma.hbm_to_vmem [thread:$0]  (!%p3071_p5), %s4488_s7, 64, %s336_s23, [#allocation15]  }
  0xd0   : > { %s2149_s18 = sadd.s32 4294967294, %s2947_s12   ;;  %s37_s20 = sadd.s32 1, %s2939_s10 }
  0xd1   : > { %p38_p7 = scmp.ge.s32.totalorder %s37_s20, 4  ;;  %s40_s22 = sadd.s32 1, %s2943_s11 }
  0xd2   : > { %s49_s13 = sadd.s32 1, %s2927_s29  ;;  %p56_p6 = scmp.ne.s32.totalorder %s2927_s29, %s2923_s28 }
  0xd3   : > { %s4613_s20 = smov (%p38_p7, %s37_s20), 0  ;;  %s4615_s22 = smov (!%p38_p7, %s40_s22), %s2943_s11 }
  0xd4   : > { %s45_s1 = ssub.s32 %s2939_s10, %s4613_s20  ;;  %p57_p5 = scmp.eq.s32.totalorder %s2947_s12, 0 }
  0xd5   : > { %p42_p8 = scmp.ge.s32.totalorder %s4615_s22, 2  ;;  %p62_p9 = scmp.ne.s32.totalorder %s2923_s28, %s2919_s27 }
  0xd6   : > { %s4528_s23 = sadd.s32 4294967295, %s2947_s12   ;;  %p241_p3 = scmp.eq.s32.totalorder %s2149_s18, 7 }
  0xd7   : > { %p235_p1 = scmp.eq.s32.totalorder %s4528_s23, 7  ;;  %s4617_s22 = smov (%p42_p8, %s4615_s22), 0 }
  0xd8   : > { %p4529_p10 = scmp.ne.s32.totalorder %s4519_s14, 0  ;;  %s44_s2 = ssub.s32 %s2943_s11, %s4617_s22 }
  0xd9   : > { %p3244_p12 = por %p235_p1, %p56_p6  ;;  %p3250_p13 = por %p241_p3, %p62_p9 }
  0xda   : > { %p3237_p11 = por %p4529_p10, %p62_p9  ;;  %s46_s3 = sor.u32 %s45_s1, %s44_s2 }
  0xdb   : > { %s4531_s9 = scalar_select %p3244_p12, 1, 0 }
  0xdc   : > { %s4532_s5 = scalar_select %p3250_p13, 1, 0 }
  0xdd   : > { %p58_p0 = por %p57_p5, %p56_p6  ;;  %p47_p2 = scmp.eq.s32.totalorder %s46_s3, 0 }
  0xde   : > { %s346_s19 = sand.u32 1, %s2927_s29   ;;  %p2484_p4 = scmp.lt.s32.totalorder %s2947_s12, 8 }
  0xdf   : > { %s2411_s16 = smul.u32 36, %s346_s19 }
  0xe0   : > { %s3260_s21 = scalar_select %p47_p2, %s2927_s29, %s49_s13  }
  0xe1   : > { %s2412_s24 = smul.u32 9, %s2939_s10  ;;  %s350_s25 = scalar_lea.vmem [#allocation2], %s2411_s16 }
  0xe2   : > { %s2413_s17 = smul.u32 36, %s2943_s11  ;;  %s360_s26 = sshll.u32 %s350_s25, 4  ;;  %s3268_s26 = int_to_ptr.vmem [resolvable:$true] %s360_s26 }
  0xe3   : > { %p3264_p7 = pnand %p2484_p4, %p58_p0  ;;  %s347_s13 = scalar_lea.sflag [#allocation3], %s346_s19 }
  0xe4   : > { %s356_s23 = sadd.s32 %s2413_s17, %s2412_s24  ;;  %s2808_s25 = scalar_lea.hbm %s4481_s0, 4608 }
  0xe5   : > { %s2159_s1 = sshll.u32 %s356_s23, 6  ;;  %p2805_p5 = pneg %p3264_p7 }
  0xe6   : > { %s3273_s4 = scalar_lea.hbm %s4481_s0, %s2159_s1 }
  0xe7   : > { %s2803_s16 = scalar_lea.hbm %s3273_s4, 576  ;;  %p2809_p1 = scmp.lt.u32.totalorder %s3273_s4, %s4481_s0 }
  0xe8   : > { %p2804_p6 = scmp.ne.s32.totalorder %s3273_s4, %s2803_s16  ;;  %p2810_p3 = scmp.lt.u32.totalorder %s2808_s25, %s2803_s16 }
  0xe9   : > { %p2812_p0 = scmp.lt.u32.totalorder %s2803_s16, %s3273_s4 }
  0xea   : > { %p2806_p8 = pnand %p2805_p5, %p2804_p6  ;;  %p2811_p10 = por %p2810_p3, %p2809_p1 }
  0xec   : > { %p2807_p9 = pneg %p2806_p8  ;;  %p2813_p2 = por %p2812_p0, %p2811_p10 }
  0xee   : > { %p2814_p4 = pnand %p2813_p2, %p2807_p9 }
  0xf0   : > { %2817 = shalt.err (!%p2814_p4)
}
  0xf1   : > { %s2818_s19 = scalar_lea.vmem %s3268_s26, 576  ;;  %s2962_s2 = smov [#allocation2]  }
  0xf2   : > { %p2819_p6 = scmp.ne.s32.totalorder %s3268_s26, %s2818_s19  ;;  %s2823_s3 = sshll.u32 %s2962_s2, 4  ;;  %s2824_s3 = int_to_ptr.vmem [resolvable:$false] %s2823_s3 }
  0xf3   : > { %s2825_s24 = scalar_lea.vmem %s2824_s3, 1152  ;;  %p2826_p12 = scmp.lt.s32.totalorder %s3268_s26, %s2824_s3 }
  0xf4   : > { %p2821_p8 = pnand %p2819_p6, %p2805_p5  ;;  %p2827_p1 = scmp.lt.s32.totalorder %s2825_s24, %s2818_s19 }
  0xf6   : > { %p2822_p13 = pneg %p2821_p8  ;;  %p2828_p3 = por %p2827_p1, %p2826_p12 }
  0xf8   : > { %p2829_p10 = pnand %p2828_p3, %p2822_p13 }
  0xfa   : > { %2832 = shalt.err (!%p2829_p10)
}
  0xfb   : > { %2472 = dma.hbm_to_vmem [thread:$0]  (!%p3264_p7), %s3273_s4, 576, %s3268_s26, %s347_s13  }
  0xfc   : > { %p4534_p9 = scmp.ne.s32.totalorder %s4520_s15, 0 }
  0xfe   : > { %369 = sbr.rel (%p4534_p9) target bundleno = 1398 (0x576), region = 52 }
 0x105   : > { %s3303_s16 = sand.u32 1, %s2923_s28  }
 0x106   : > { %s2414_s17 = smul.u32 36, %s3303_s16  ;;  %s372_s25 = scalar_lea.sflag [#allocation3], %s3303_s16 }
 0x108   : > { %s3307_s23 = scalar_lea.vmem [#allocation2], %s2414_s17 }
 0x109   : > { %2894 = dma.done.wait (%p3237_p11), %s372_s25, 576  }
 0x10a   : > { %2896 = vsyncadd (%p3237_p11), %s372_s25, 4294966720  ;;  %p4535_p12 = scmp.ne.s32.totalorder %s4519_s14, 0 }
 0x10c   : > { %2898 = dma.done.wait (%p4535_p12), [#allocation6], 496  }
 0x10d   : > { %2900 = vsyncadd (%p4535_p12), [#allocation6], 4294966800 }
 0x10e   : > { %2902 = dma.done.wait (%p4535_p12), [#allocation9], 2304  }
 0x10f   : > { %2904 = vsyncadd (%p4535_p12), [#allocation9], 4294964992 }
 0x110   : > { %2906 = dma.done.wait (%p4535_p12), [#allocation12], 800  }
 0x111   : > { %2908 = vsyncadd (%p4535_p12), [#allocation12], 4294966496 }
 0x112   : > { %2910 = dma.done.wait (%p4535_p12), [#allocation15], 64  }
 0x113   : > { %2912 = vsyncadd (%p4535_p12), [#allocation15], 4294967232  ;;  %v438_v0 = vld [vmem:[%s3307_s23] sm:$0xff]  ;;  %v439_v1 = vld [vmem:[%s3307_s23 + $0x8] sm:$0xff]  ;;  %s2963_s4 = smov 127   ;;  %s2964_s14 = smov 126  }
 0x114   : > { %v3331_v2 = vcombine.high %v438_v0, %v438_v0  ;;  %v2169_v3 = vcombine.low %v438_v0, %v438_v0  ;;  %v3336_v4 = vcombine.low %v439_v1, %v439_v1  ;;  %v3345_v5 = vcombine.high %v439_v1, %v439_v1  ;;  %v440_v6 = vld [vmem:[%s3307_s23 + $0x10] sm:$0xff]  ;;  %v441_v8 = vld [vmem:[%s3307_s23 + $0x18] sm:$0xff]  ;;  %v3382_v13 = vld [vmem:[%s3307_s23 + $0x20] ss:$0 sps:$4 sm:$0xff]   ;;  %s3485_s15 = sshll.u32 %s2931_s30, 2  ;;  %s4601_s30 = sld [smem:[#allocation23_spill]] }
 0x115   : > { %v3352_v7 = vcombine.low %v440_v6, %v440_v6  ;;  %v4497_v9 = vmov 0   ;;  %v3363_v10 = vcombine.high %v440_v6, %v440_v6  ;;  %v3365_v11 = vcombine.low %v441_v8, %v441_v8  ;;  %v604_v14 = vld [vmem:[#allocation8] sm:$0xff]  ;;  %v605_v15 = vld [vmem:[#allocation8 + $0x8] sm:$0xff]  ;;  %v607_v16 = vld [vmem:[#allocation8 + $0x18] sm:$0xff]  ;;  %s1062_s8 = ssub.s32 1, %s3485_s15  ;;  %s1066_s26 = ssub.s32 17, %s3485_s15 }
 0x116   : > { %463 = vrot.lane.b32.xlu0 %v3331_v2, %s2963_s4  ;;  %461 = vrot.lane.b32.xlu1 %v2169_v3, %s2963_s4  ;;  %v3375_v12 = vcombine.high %v441_v8, %v441_v8  ;;  %v606_v17 = vld [vmem:[#allocation8 + $0x10] sm:$0xff]  ;;  %v609_v18 = vld [vmem:[#allocation8 + $0x28] sm:$0xff]  ;;  %v608_v19 = vld [vmem:[#allocation8 + $0x20] sm:$0xff]  ;;  %vm475_vm0 = vcmask 1039360   ;;  %vm520_vm1 = vcmask 1043456   ;;  %vm4496_vm2 = vcmask 1031168  }
 0x117   : > { %713 = vmatprep.mubr.bf16.mxu0 %v4497_v9  ;;  %776 = vmatprep.mubr.bf16.mxu1 %v4497_v9  ;;  %v3416_v52 = vld [vmem:[#allocation7] sm:$0xff]   ;;  %vm655_vm3 = vcmask 588800   ;;  %vm2967_vm4 = vmmov 0   ;;  %p1063_p11 = scmp.gt.s32.totalorder %s1062_s8, 0  ;;  %s2198_s13 = sshll.u32 %s1066_s26, 7 }
 0x118   : > { %2576 = vset.pattern.permute.xlu1 %v4497_v9  ;;  %2575 = vset.pattern.permute.xlu0 %v4497_v9  ;;  %s2168_s19 = sshll.u32 %s3303_s16, 4  ;;  %p4603_p7 = scmp.ne.s32.totalorder %s4531_s9, 0 }
 0x119   : > { %s4619_s8 = smov (!%p1063_p11, %s1062_s8), 0  ;;  %s435_s24 = scalar_lea.vmem [#allocation16], %s2168_s19 }
 0x11a   : > { %465 = vrot.lane.b32.xlu0 %v3336_v4, %s2963_s4  ;;  %484 = vrot.lane.b32.xlu1 %v3331_v2, %s2964_s14  ;;  %s2197_s18 = sshll.u32 %s4619_s8, 7  ;;  %s2329_s1 = sshll.u32 %s4601_s30, 4 }
 0x11b   : > { %s1990_s2 = sadd.s32 %s2329_s1, %s3485_s15  ;;  %s1994_s17 = sshll.u32 %s435_s24, 4  ;;  %s4429_s17 = int_to_ptr.vmem [resolvable:$true] %s1994_s17 }
 0x11c   : > { %s2330_s3 = sshll.u32 %s1990_s2, 6  ;;  %s1978_s15 = scalar_lea.sflag [#allocation4], %s3303_s16 }
 0x11d   : > { %s2833_s8 = scalar_lea.vmem %s4429_s17, 256  ;;  %s2968_s26 = smov [#allocation16]  }
 0x11e   : > { %486 = vrot.lane.b32.xlu0 %v3336_v4, %s2964_s14  ;;  %482 = vrot.lane.b32.xlu1 %v2169_v3, %s2964_s14  ;;  %p2834_p13 = scmp.ne.s32.totalorder %s4429_s17, %s2833_s8 }
 0x120   : > { %p2835_p5 = pnand %p2834_p13, %p4603_p7 }
 0x122   : > { %467 = vrot.lane.b32.xlu0 %v3345_v5, %s2963_s4  ;;  %488 = vrot.lane.b32.xlu1 %v3345_v5, %s2964_s14  ;;  %p2836_p0 = pneg %p2835_p5 }
 0x126   : > { %469 = vrot.lane.b32.xlu0 %v3352_v7, %s2963_s4  ;;  %490 = vrot.lane.b32.xlu1 %v3352_v7, %s2964_s14 }
 0x12a   : > { %471 = vrot.lane.b32.xlu0 %v3363_v10, %s2963_s4  ;;  %473 = vrot.lane.b32.xlu1 %v3365_v11, %s2963_s4 }
 0x12e   : > { %492 = vrot.lane.b32.xlu0 %v3363_v10, %s2964_s14  ;;  %494 = vrot.lane.b32.xlu1 %v3365_v11, %s2964_s14 }
 0x132   : > { %505 = vrot.lane.b32.xlu0 %v3375_v12, %s2963_s4  ;;  %508 = vrot.lane.b32.xlu1 %v3375_v12, %s2964_s14 }
 0x136   : > { %514 = vrot.lane.b32.xlu0 %v3382_v13, %s2963_s4  ;;  %517 = vrot.lane.b32.xlu1 %v3382_v13, %s2964_s14 }
 0x13a   : > { %612 = vperm.xlu0 %2575, %v604_v14   ;;  %617 = vperm.xlu1 %2576, %v605_v15  }
 0x13e   : > { %627 = vperm.xlu0 %2575, %v607_v16   ;;  %622 = vperm.xlu1 %2576, %v606_v17   ;;  %v2966_v16 = vmov 0.0  }
 0x142   : > { %637 = vperm.xlu0 %2575, %v609_v18   ;;  %632 = vperm.xlu1 %2576, %v608_v19  }
 0x188   : > { %v464_v20 = vpop.permute.xlu0 %463  ;;  %v462_v21 = vpop.permute.xlu1 %461 }
 0x189   : > { %v476_v22 = vsel %vm475_vm0, %v462_v21, %v464_v20 }
 0x18a   : > { %v523_v27 = vsel %vm520_vm1, %v2169_v3, %v476_v22 }
 0x18c   : > { %v466_v23 = vpop.permute.xlu0 %465  ;;  %v485_v24 = vpop.permute.xlu1 %484 }
 0x18d   : > { %v477_v25 = vsel %vm475_vm0, %v464_v20, %v466_v23  ;;  %v2588_v20 = vld [vmem:[#allocation7 + $0x10] sm:$0xff]  }
 0x18e   : > { %v527_v26 = vsel %vm520_vm1, %v3331_v2, %v477_v25 }
 0x18f   : > { %681 = vmatprep.subr.bf16.mxu0 %v527_v26  ;;  %v3479_v26 = vld [vmem:[#allocation5] sm:$0x7f] }
 0x190   : > { %v487_v28 = vpop.permute.xlu0 %486  ;;  %682 = vmatpush1.bf16.msra.mxu0 %v523_v27  ;;  %v483_v29 = vpop.permute.xlu1 %482 }
 0x191   : > { %v498_v30 = vsel %vm4496_vm2, %v485_v24, %v487_v28  ;;  %v497_v31 = vsel %vm4496_vm2, %v483_v29, %v485_v24 }
 0x192   : > { %v553_v32 = vsel %vm520_vm1, %v498_v30, %v3336_v4  ;;  %v550_v33 = vsel %vm520_vm1, %v497_v31, %v3331_v2  ;;  %v571_v39 = vsel %vm520_vm1, %v477_v25, %v498_v30 }
 0x193   : > { %683 = vmatprep.subr.bf16.mxu0 %v553_v32  ;;  %v3496_v32 = vstv %s2197_s18  ;;  %s2837_s18 = sshll.u32 %s2968_s26, 4  ;;  %s2838_s18 = int_to_ptr.vmem [resolvable:$false] %s2837_s18 }
 0x194   : > { %v468_v34 = vpop.permute.xlu0 %467  ;;  %684 = vmatpush1.bf16.msra.mxu0 %v550_v33  ;;  %v489_v35 = vpop.permute.xlu1 %488  ;;  %v3498_v33 = vstv %s2198_s13  ;;  %s2839_s13 = scalar_lea.vmem %s2838_s18, 512  ;;  %p2840_p2 = scmp.lt.s32.totalorder %s4429_s17, %s2838_s18 }
 0x195   : > { %v478_v36 = vsel %vm475_vm0, %v466_v23, %v468_v34  ;;  %v499_v37 = vsel %vm4496_vm2, %v487_v28, %v489_v35  ;;  %p2841_p4 = scmp.lt.s32.totalorder %s2839_s13, %s2833_s8 }
 0x196   : > { %v573_v38 = vsel %vm520_vm1, %v478_v36, %v499_v37  ;;  %v531_v45 = vsel %vm520_vm1, %v3336_v4, %v478_v36  ;;  %v665_v50 = vsel %vm520_vm1, %v499_v37, 0  ;;  %v556_v51 = vsel %vm520_vm1, %v499_v37, %v3345_v5  ;;  %v2587_v4 = vld [vmem:[#allocation7 + $0x8] sm:$0xff]  }
 0x197   : > { %685 = vmatprep.subr.bf16.mxu0 %v573_v38  ;;  %v4539_v36 = vmov 0  ;;  %p2842_p6 = por %p2841_p4, %p2840_p2 }
 0x198   : > { %v470_v40 = vpop.permute.xlu0 %469  ;;  %686 = vmatpush1.bf16.msra.mxu0 %v571_v39  ;;  %v491_v41 = vpop.permute.xlu1 %490 }
 0x199   : > { %v479_v42 = vsel %vm475_vm0, %v468_v34, %v470_v40  ;;  %v500_v43 = vsel %vm4496_vm2, %v489_v35, %v491_v41  ;;  %v4536_v34 = vmov 0  ;;  %p2843_p8 = pnand %p2842_p6, %p2836_p0 }
 0x19a   : > { %v535_v44 = vsel %vm520_vm1, %v3345_v5, %v479_v42  ;;  %v559_v48 = vsel %vm520_vm1, %v500_v43, %v3352_v7  ;;  %v575_v60 = vsel %vm520_vm1, %v479_v42, %v500_v43 }
 0x19b   : > { %687 = vmatprep.subr.bf16.mxu0 %v535_v44  ;;  %744 = vmatprep.subr.bf16.mxu1 %v535_v44 }
 0x19c   : > { %745 = vmatpush1.bf16.msra.mxu1 %v531_v45  ;;  %v472_v46 = vpop.permute.xlu0 %471  ;;  %688 = vmatpush1.bf16.msra.mxu0 %v531_v45  ;;  %v474_v47 = vpop.permute.xlu1 %473 }
 0x19d   : > { %v481_v49 = vsel %vm475_vm0, %v472_v46, %v474_v47  ;;  %2181 = vmatprep.subr.msk.bf16.mxu0 %vm520_vm1, %v500_v43  ;;  %746 = vmatprep.subr.bf16.mxu1 %v559_v48  ;;  %v480_v53 = vsel %vm475_vm0, %v470_v40, %v472_v46  ;;  %v547_v19 = vsel %vm520_vm1, %v3365_v11, %v474_v47 }
 0x19e   : > { %v543_v56 = vsel %vm520_vm1, %v3363_v10, %v481_v49  ;;  %v539_v61 = vsel %vm520_vm1, %v3352_v7, %v480_v53 }
 0x1a0   : > { %v493_v54 = vpop.permute.xlu0 %492  ;;  %690 = vmatpush1.bf16.msra.mxu0 %v665_v50  ;;  %747 = vmatpush1.bf16.msra.mxu1 %v556_v51  ;;  %v495_v55 = vpop.permute.xlu1 %494 }
 0x1a1   : > { %v501_v57 = vsel %vm4496_vm2, %v491_v41, %v493_v54  ;;  %v502_v58 = vsel %vm4496_vm2, %v493_v54, %v495_v55  ;;  %807 = vmatprep.subr.bf16.mxu0 %v543_v56  ;;  %v569_v22 = vsel %vm520_vm1, %v495_v55, %v3375_v12 }
 0x1a2   : > { %v577_v59 = vsel %vm520_vm1, %v480_v53, %v501_v57  ;;  %v565_v0 = vsel %vm520_vm1, %v502_v58, %v3365_v11  ;;  %v562_v3 = vsel %vm520_vm1, %v501_v57, %v3363_v10  ;;  %v669_v14 = vsel %vm520_vm1, %v501_v57, 0 }
 0x1a3   : > { %2182 = vmatmul.mubr.msk.bf16.vlgmr.msra.gmra.mrb[0].mxu0 %vm655_vm3, %v3416_v52  ;;  %748 = vmatprep.subr.bf16.mxu1 %v577_v59  ;;  %v579_v10 = vsel %vm520_vm1, %v481_v49, %v502_v58 }
 0x1a4   : > { %v506_v62 = vpop.permute.xlu0 %505  ;;  %749 = vmatpush1.bf16.msra.mxu1 %v575_v60  ;;  %808 = vmatpush1.bf16.msra.mxu0 %v539_v61  ;;  %v509_v63 = vpop.permute.xlu1 %508 }
 0x1a5   : > { %v507_v1 = vsel %vm475_vm0, %v474_v47, %v506_v62  ;;  %v510_v2 = vsel %vm4496_vm2, %v495_v55, %v509_v63  ;;  %750 = vmatprep.subr.bf16.mxu1 %v543_v56  ;;  %809 = vmatprep.subr.bf16.mxu0 %v565_v0 }
 0x1a6   : > { %723 = vmatprep.mubr.bf16.mxu0 %v4497_v9  ;;  %v583_v5 = vsel %vm520_vm1, %v507_v1, %v510_v2  ;;  %v589_v18 = vsel %vm520_vm1, %v3365_v11, %v507_v1  ;;  %v673_v21 = vsel %vm520_vm1, %v510_v2, 0  ;;  %v587_v11 = vsel %vm520_vm1, %v506_v62, %v509_v63 }
 0x1a8   : > { %751 = vmatpush1.bf16.msra.mxu1 %v539_v61  ;;  %810 = vmatpush1.bf16.msra.mxu0 %v562_v3  ;;  %v515_v6 = vpop.permute.xlu0 %514  ;;  %v518_v15 = vpop.permute.xlu1 %517 }
 0x1a9   : > { %2185 = vmatprep.subr.msk.bf16.mxu1 %vm520_vm1, %v502_v58  ;;  %811 = vmatprep.subr.bf16.mxu0 %v583_v5  ;;  %v516_v7 = vsel %vm475_vm0, %v506_v62, %v515_v6  ;;  %v519_v17 = vsel %vm4496_vm2, %v509_v63, %v518_v15  ;;  %v596_v23 = vsel %vm520_vm1, %v3382_v13, %v515_v6  ;;  %v1053_v13 = vlaneseq }
 0x1aa   : > { %v592_v8 = vsel %vm520_vm1, %v3375_v12, %v516_v7  ;;  %v679_v12 = vsel %vm520_vm1, %v518_v15, 0 }
 0x1ab   : > { %2183 = vmatmul.mubr.msk.bf16.gmra.mrb[4].mxu0 %vm655_vm3, %v2587_v4  ;;  %v3476_v24 = vshrl.u32 %v1053_v13, 7  ;;  %v3493_v30 = vand.u32 127, %v1053_v13 }
 0x1ac   : > { %753 = vmatpush1.bf16.msra.mxu1 %v669_v14  ;;  %812 = vmatpush1.bf16.msra.mxu0 %v579_v10 }
 0x1ad   : > { %813 = vmatprep.subr.bf16.mxu0 %v592_v8  ;;  %2341 = vmatprep.subr.bf16.mxu1 %v2966_v16  ;;  %v1115_v25 = vsub.s32 5, %v3476_v24  ;;  %v1119_v28 = vsub.s32 6, %v3476_v24  ;;  %v1059_v31 = vadd.s32 640, %v3493_v30  ;;  %v1060_v35 = vadd.s32 768, %v3493_v30 }
 0x1ae   : > { %733 = vmatprep.mubr.bf16.mxu0 %v4497_v9  ;;  %v1099_v37 = vsub.s32 1, %v3476_v24  ;;  %v1095_v38 = vsub.s32 0, %v3476_v24  ;;  %v1055_v39 = vadd.s32 128, %v3493_v30  ;;  %v1103_v46 = vsub.s32 2, %v3476_v24 }
 0x1af   : > { %2186 = vmatmul.mubr.msk.bf16.vlgmr.msra.gmra.mrb[0].mxu1 %vm655_vm3, %v3416_v52  ;;  %v3482_v27 = vrot.slane %v3479_v26, %v1115_v25  ;;  %v3490_v29 = vrot.slane %v3479_v26, %v1119_v28  ;;  %vm1074_vm5 = vcmp.ge.s32.totalorder %v1059_v31, %v3496_v32  ;;  %vm1082_vm6 = vcmp.lt.s32.totalorder %v1059_v31, %v3498_v33 }
 0x1b0   : > { %814 = vmatpush1.bf16.msra.mxu0 %v589_v18  ;;  %2342 = vmatpush3.bf16.msra.mxu1 %v547_v19  ;;  %vm3502_vm7 = vmand %vm1074_vm5, %vm1082_vm6  ;;  %vm1075_vm8 = vcmp.ge.s32.totalorder %v1060_v35, %v3496_v32  ;;  %vm1083_vm9 = vcmp.lt.s32.totalorder %v1060_v35, %v3498_v33  ;;  %v3519_v43 = vrot.slane %v3479_v26, %v1099_v37  ;;  %v1107_v50 = vsub.s32 3, %v3476_v24 }
 0x1b1   : > { %2189 = vmatprep.subr.msk.bf16.mxu0 %vm520_vm1, %v519_v17  ;;  %2343 = vmatprep.subr.bf16.mxu1 %v2966_v16  ;;  %v4537_v34 = vsel %vm3502_vm7, 4294967295, %v4536_v34  ;;  %vm3509_vm10 = vmand %vm1075_vm8, %vm1083_vm9  ;;  %v3523_v45 = vrot.slane %v3479_v26, %v1095_v38  ;;  %vm1070_vm11 = vcmp.ge.s32.totalorder %v1055_v39, %v3496_v32  ;;  %vm1069_vm12 = vcmp.ge.s32.totalorder %v3493_v30, %v3496_v32 }
 0x1b2   : > { %786 = vmatprep.mubr.bf16.mxu1 %v4497_v9  ;;  %4538 = vst [vmem:[#allocation24_spill] sm:$0xff] %v4537_v34  ;;  %v4540_v36 = vsel %vm3509_vm10, 4294967295, %v4539_v36  ;;  %vm1077_vm14 = vcmp.lt.s32.totalorder %v3493_v30, %v3498_v33  ;;  %vm1078_vm1 = vcmp.lt.s32.totalorder %v1055_v39, %v3498_v33  ;;  %v1111_v58 = vsub.s32 4, %v3476_v24 }
 0x1b3   : > { %2184 = vmatmul.mubr.msk.bf16.gmra.mrb[8].mxu0 %vm655_vm3, %v2588_v20  ;;  %4541 = vst [vmem:[#allocation25_spill] sm:$0xff] %v4540_v36  ;;  %vm3543_vm5 = vmand %vm1069_vm12, %vm1077_vm14  ;;  %v3551_v1 = vrot.slane %v3479_v26, %v1103_v46  ;;  %v3554_v2 = vrot.slane %v3479_v26, %v1107_v50  ;;  %v3566_v8 = vadd.s32 384, %v3493_v30  ;;  %v3569_v14 = vadd.s32 256, %v3493_v30 }
 0x1b4   : > { %816 = vmatpush1.bf16.msra.mxu0 %v673_v21  ;;  %2344 = vmatpush3.bf16.msra.mxu1 %v569_v22  ;;  %vm3558_vm6 = vmand %vm1070_vm11, %vm1078_vm1  ;;  %v3578_v18 = vrot.slane %v3479_v26, %v1111_v58 }
 0x1b5   : > { %2345 = vmatprep.subr.bf16.mxu1 %v2966_v16  ;;  %839 = vmatprep.mubr.bf16.mxu0 %v4497_v9  ;;  %vm3585_vm8 = vmpackc.low %vm3558_vm6, %vm3558_vm6 }
 0x1b6   : > { %vm3605_vm11 = vmpackc.low %vm3543_vm5, %vm3543_vm5 }
 0x1b7   : > { %2187 = vmatmul.mubr.msk.bf16.gmra.mrb[4].mxu1 %vm655_vm3, %v2587_v4 }
 0x1b8   : > { %2346 = vmatpush3.bf16.msra.mxu1 %v587_v11  ;;  %796 = vmatprep.mubr.bf16.mxu1 %v4497_v9 }
 0x1b9   : > { %2347 = vmatprep.subr.bf16.mxu1 %v2966_v16  ;;  %v3516_v41 = vpop.permute.xlu0 %612  ;;  %v3527_v48 = vpop.permute.xlu1 %617 }
 0x1bb   : > { %2190 = vmatmul.mubr.msk.bf16.vlgmr.msra.gmra.mrb[12].mxu0 %vm655_vm3, %v3416_v52 }
 0x1bc   : > { %2348 = vmatpush3.bf16.msra.mxu1 %v596_v23  ;;  %849 = vmatprep.mubr.bf16.mxu0 %v4497_v9 }
 0x1bd   : > { %2349 = vmatprep.subr.bf16.mxu1 %v2966_v16  ;;  %v3563_v7 = vpop.permute.xlu1 %622 }
 0x1bf   : > { %2188 = vmatmul.mubr.msk.bf16.gmra.mrb[8].mxu1 %vm655_vm3, %v2588_v20 }
 0x1c0   : > { %2350 = vmatpush3.bf16.msra.mxu1 %v679_v12  ;;  %2351 = vmatprep.mubr.msk.bf16.mxu1 %vm2967_vm4, %v2966_v16  ;;  %v3595_v12 = vadd.s32 512, %v3493_v30 }
 0x1c3   : > { %2191 = vmatmul.mubr.msk.bf16.gmra.mrb[16].mxu0 %vm655_vm3, %v2587_v4 }
 0x1c4   : > { %859 = vmatprep.mubr.bf16.mxu0 %v4497_v9 }
 0x1c7   : > { %2352 = vmatmul.mubr.msk.bf16.vlgmr.msra.gmra.mrb[12].mxu1 %vm655_vm3, %v3416_v52 }
 0x1c8   : > { %2355 = vmatprep.mubr.msk.bf16.mxu1 %vm2967_vm4, %v2966_v16 }
 0x1cb   : > { %2192 = vmatmul.mubr.msk.bf16.gmra.mrb[20].mxu0 %vm655_vm3, %v2588_v20 }
 0x1cf   : > { %2356 = vmatmul.mubr.msk.bf16.gmra.mrb[16].mxu1 %vm655_vm3, %v2587_v4 }
 0x1d0   : > { %2359 = vmatprep.mubr.msk.bf16.mxu1 %vm2967_vm4, %v2966_v16 }
 0x1d7   : > { %2360 = vmatmul.mubr.msk.bf16.gmra.mrb[20].mxu1 %vm655_vm3, %v2588_v20  ;;  %v3580_v20 = vpop.permute.xlu0 %627 }
 0x276   : > { %v715_v40 = vpop.f32.mrb[0].mxu0 }
 0x277   : > { %v717_v42 = vpop.f32.mrb[1].mxu0  ;;  %v716_v44 = vadd.f32 %v715_v40, %v3516_v41 }
 0x278   : > { %v718_v47 = vadd.f32 %v717_v42, %v3516_v41  ;;  %v719_v49 = vpop.f32.mrb[2].mxu0 }
 0x279   : > { %v720_v51 = vadd.f32 %v719_v49, %v3527_v48  ;;  %vm927_vm13 = vcmp.ge.f32.partialorder %v716_v44, 0.0  ;;  %v969_v52 = vmul.f32 0.2, %v716_v44  ;;  %v721_v53 = vpop.f32.mrb[3].mxu0 }
 0x27a   : > { %vm928_vm15 = vcmp.ge.f32.partialorder %v718_v47, 0.0  ;;  %v970_v54 = vmul.f32 0.2, %v718_v47  ;;  %v722_v55 = vadd.f32 %v721_v53, %v3527_v48 }
 0x27b   : > { %vm934_vm3 = vcmp.ge.f32.partialorder %v720_v51, 0.0  ;;  %v976_v56 = vmul.f32 0.2, %v720_v51  ;;  %v1011_v57 = vsel %vm927_vm13, %v716_v44, %v969_v52 }
 0x27c   : > { %v1012_v59 = vsel %vm928_vm15, %v718_v47, %v970_v54  ;;  %v1128_v60 = vmul.f32 %v3523_v45, %v1011_v57  ;;  %vm935_vm4 = vcmp.ge.f32.partialorder %v722_v55, 0.0  ;;  %v977_v61 = vmul.f32 0.2, %v722_v55 }
 0x27d   : > { %v3548_v63 = vmul.f32 %v3519_v43, %v1012_v59  ;;  %v1018_v0 = vsel %vm934_vm3, %v720_v51, %v976_v56 }
 0x27e   : > { %v1135_v4 = vmul.f32 %v3523_v45, %v1018_v0  ;;  %v1019_v5 = vsel %vm935_vm4, %v722_v55, %v977_v61  ;;  %v725_v6 = vpop.f32.mrb[4].mxu0  ;;  %v1184_v17 = vsel %vm3543_vm5, %v1128_v60, 0.0  ;;  %vm1071_vm4 = vcmp.ge.s32.totalorder %v3569_v14, %v3496_v32 }
 0x27f   : > { %v3572_v10 = vmul.f32 %v3519_v43, %v1019_v5  ;;  %v727_v15 = vpop.f32.mrb[5].mxu0  ;;  %v726_v16 = vadd.f32 %v725_v6, %v3563_v7 }
 0x280   : > { %v2215_v19 = vpack.c.bf16 %v1135_v4, %v1128_v60  ;;  %v729_v21 = vpop.f32.mrb[6].mxu0  ;;  %v1191_v11 = vsel %vm3543_vm5, %v1135_v4, 0.0  ;;  %v3592_v23 = vadd.f32 %v727_v15, %v3563_v7  ;;  %v3647_v15 = vpop.permute.xlu1 %632 }
 0x281   : > { %v730_v13 = vadd.f32 %v729_v21, %v3580_v20  ;;  %vm941_vm9 = vcmp.ge.f32.partialorder %v726_v16, 0.0  ;;  %v983_v24 = vmul.f32 0.2, %v726_v16  ;;  %v731_v25 = vpop.f32.mrb[7].mxu0  ;;  %v3600_v26 = vpack.c.bf16 %v3572_v10, %v3548_v63 }
 0x282   : > { %v732_v31 = vadd.f32 %v731_v25, %v3580_v20  ;;  %v778_v30 = vpop.f32.mrb[0].mxu1  ;;  %v3610_v35 = vpack.c.bf16 %v1191_v11, %v1184_v17  ;;  %v3613_v37 = vmul.f32 0.2, %v3592_v23  ;;  %vm942_vm15 = vcmp.ge.f32.partialorder %v3592_v23, 0.0 }
 0x283   : > { %4548 = vst [vmem:[#allocation26_spill] sm:$0xff] %v3600_v26  ;;  %vm948_vm12 = vcmp.ge.f32.partialorder %v730_v13, 0.0  ;;  %v990_v39 = vmul.f32 0.2, %v730_v13  ;;  %v1025_v40 = vsel %vm941_vm9, %v726_v16, %v983_v24  ;;  %v779_v42 = vadd.f32 %v778_v30, %v3516_v41  ;;  %v780_v44 = vpop.f32.mrb[1].mxu1  ;;  %2213 = vmatprep.subr.msk.bf16.mxu0 %vm3585_vm8, %v3600_v26 }
 0x284   : > { %v3623_v46 = vmul.f32 %v3523_v45, %v1025_v40  ;;  %vm949_vm13 = vcmp.ge.f32.partialorder %v732_v31, 0.0  ;;  %v991_v47 = vmul.f32 0.2, %v732_v31  ;;  %v781_v49 = vadd.f32 %v780_v44, %v3516_v41  ;;  %v782_v50 = vpop.f32.mrb[2].mxu1  ;;  %2216 = vmatpush1.bf16.msk.msra.mxu0 %vm3605_vm11, %v2215_v19  ;;  %1262 = vrot.lane.b32.xlu1 %v3610_v35, %s2963_s4  ;;  %v3654_v19 = vpop.permute.xlu0 %637 }
 0x285   : > { %v1032_v51 = vsel %vm948_vm12, %v730_v13, %v990_v39  ;;  %vm929_vm14 = vcmp.ge.f32.partialorder %v779_v42, 0.0  ;;  %v971_v52 = vmul.f32 0.2, %v779_v42  ;;  %v783_v53 = vadd.f32 %v782_v50, %v3527_v48  ;;  %v784_v54 = vpop.f32.mrb[3].mxu1 }
 0x286   : > { %v3633_v55 = vmul.f32 %v3523_v45, %v1032_v51  ;;  %v1033_v56 = vsel %vm949_vm13, %v732_v31, %v991_v47  ;;  %vm930_vm1 = vcmp.ge.f32.partialorder %v781_v49, 0.0  ;;  %v972_v57 = vmul.f32 0.2, %v781_v49  ;;  %v735_v58 = vpop.f32.mrb[8].mxu0 }
 0x287   : > { %v3636_v59 = vmul.f32 %v3519_v43, %v1033_v56  ;;  %v1013_v60 = vsel %vm929_vm14, %v779_v42, %v971_v52  ;;  %vm936_vm3 = vcmp.ge.f32.partialorder %v783_v53, 0.0  ;;  %v978_v61 = vmul.f32 0.2, %v783_v53  ;;  %v737_v0 = vpop.f32.mrb[9].mxu0 }
 0x288   : > { %4551 = vst [vmem:[#allocation27_spill] sm:$0xff] %v3633_v55  ;;  %vm1079_vm9 = vcmp.lt.s32.totalorder %v3569_v14, %v3498_v33  ;;  %v2221_v4 = vpack.c.bf16 %v3633_v55, %v3623_v46  ;;  %v3645_v5 = vmul.f32 %v3551_v1, %v1013_v60  ;;  %v1014_v6 = vsel %vm930_vm1, %v781_v49, %v972_v57  ;;  %v739_v17 = vpop.f32.mrb[10].mxu0 }
 0x289   : > { %v785_v16 = vadd.f32 %v784_v54, %v3527_v48  ;;  %vm1072_vm12 = vcmp.ge.s32.totalorder %v3566_v8, %v3496_v32  ;;  %vm1080_vm13 = vcmp.lt.s32.totalorder %v3566_v8, %v3498_v33  ;;  %v3657_v21 = vmul.f32 %v3554_v2, %v1014_v6  ;;  %v741_v25 = vpop.f32.mrb[11].mxu0 }
 0x28a   : > { %v1020_v11 = vsel %vm936_vm3, %v783_v53, %v978_v61  ;;  %v736_v13 = vadd.f32 %v735_v58, %v3647_v15  ;;  %v738_v24 = vadd.f32 %v737_v0, %v3647_v15  ;;  %v740_v39 = vadd.f32 %v739_v17, %v3654_v19  ;;  %v788_v40 = vpop.f32.mrb[4].mxu1 }
 0x28b   : > { %v3662_v31 = vmul.f32 %v3551_v1, %v1020_v11  ;;  %vm937_vm14 = vcmp.ge.f32.partialorder %v785_v16, 0.0  ;;  %v979_v30 = vmul.f32 0.2, %v785_v16  ;;  %v790_v51 = vpop.f32.mrb[5].mxu1  ;;  %v742_v56 = vadd.f32 %v741_v25, %v3654_v19 }
 0x28c   : > { %vm955_vm1 = vcmp.ge.f32.partialorder %v736_v13, 0.0  ;;  %v997_v42 = vmul.f32 0.2, %v736_v13  ;;  %vm956_vm2 = vcmp.ge.f32.partialorder %v738_v24, 0.0  ;;  %v998_v44 = vmul.f32 0.2, %v738_v24 }
 0x28d   : > { %v3667_v47 = vpack.c.bf16 %v3662_v31, %v3645_v5  ;;  %v1021_v49 = vsel %vm937_vm14, %v785_v16, %v979_v30  ;;  %vm962_vm3 = vcmp.ge.f32.partialorder %v740_v39, 0.0  ;;  %v1004_v50 = vmul.f32 0.2, %v740_v39  ;;  %v792_v57 = vpop.f32.mrb[6].mxu1 }
 0x28e   : > { %v3670_v52 = vmul.f32 %v3554_v2, %v1021_v49  ;;  %v1039_v53 = vsel %vm955_vm1, %v736_v13, %v997_v42  ;;  %v1040_v54 = vsel %vm956_vm2, %v738_v24, %v998_v44  ;;  %v789_v0 = vadd.f32 %v788_v40, %v3563_v7  ;;  %v794_v6 = vpop.f32.mrb[7].mxu1  ;;  %v841_v16 = vpop.f32.mrb[12].mxu0 }
 0x28f   : > { %4552 = vst [vmem:[#allocation28_spill] sm:$0xff] %v3667_v47  ;;  %v3674_v58 = vmul.f32 %v3523_v45, %v1039_v53  ;;  %v3677_v60 = vmul.f32 %v3519_v43, %v1040_v54  ;;  %v1046_v61 = vsel %vm962_vm3, %v740_v39, %v1004_v50  ;;  %vm963_vm14 = vcmp.ge.f32.partialorder %v742_v56, 0.0  ;;  %v843_v24 = vpop.f32.mrb[13].mxu0 }
 0x290   : > { %v3681_v17 = vmul.f32 %v3523_v45, %v1046_v61  ;;  %v1005_v11 = vmul.f32 0.2, %v742_v56  ;;  %v791_v13 = vadd.f32 %v790_v51, %v3563_v7  ;;  %vm943_vm2 = vcmp.ge.f32.partialorder %v789_v0, 0.0  ;;  %v845_v40 = vpop.f32.mrb[14].mxu0 }
 0x291   : > { %v985_v25 = vmul.f32 0.2, %v789_v0  ;;  %v1026_v30 = vsel %vm942_vm15, %v3592_v23, %v3613_v37  ;;  %v793_v39 = vadd.f32 %v792_v57, %v3580_v20  ;;  %v847_v49 = vpop.f32.mrb[15].mxu0  ;;  %vm3703_vm15 = vmand %vm1071_vm4, %vm1079_vm9 }
 0x292   : > { %v1047_v45 = vsel %vm963_vm14, %v742_v56, %v1005_v11  ;;  %vm944_vm1 = vcmp.ge.f32.partialorder %v791_v13, 0.0  ;;  %v986_v44 = vmul.f32 0.2, %v791_v13  ;;  %v3695_v53 = vmul.f32 %v3519_v43, %v1026_v30  ;;  %v798_v37 = vpop.f32.mrb[8].mxu1  ;;  %vm3717_vm14 = vmand %vm1072_vm12, %vm1080_vm13 }
 0x293   : > { %v3692_v50 = vmul.f32 %v3519_v43, %v1047_v45  ;;  %v1027_v51 = vsel %vm943_vm2, %v789_v0, %v985_v25  ;;  %vm950_vm3 = vcmp.ge.f32.partialorder %v793_v39, 0.0  ;;  %v992_v57 = vmul.f32 0.2, %v793_v39  ;;  %v800_v61 = vpop.f32.mrb[9].mxu1  ;;  %vm3733_vm4 = vmpackc.low %vm3717_vm14, %vm3717_vm14 }
 0x294   : > { %v3708_v54 = vmul.f32 %v3551_v1, %v1027_v51  ;;  %v1028_v56 = vsel %vm944_vm1, %v791_v13, %v986_v44  ;;  %v795_v43 = vadd.f32 %v794_v6, %v3580_v20  ;;  %v3726_v11 = vpack.c.bf16 %v3636_v59, %v3695_v53  ;;  %v802_v25 = vpop.f32.mrb[10].mxu1  ;;  %vm3744_vm12 = vmpackc.low %vm3703_vm15, %vm3703_vm15 }
 0x295   : > { %v3722_v0 = vmul.f32 %v3554_v2, %v1028_v56  ;;  %v842_v6 = vadd.f32 %v841_v16, %v3516_v41  ;;  %v844_v13 = vadd.f32 %v843_v24, %v3516_v41  ;;  %v1034_v30 = vsel %vm950_vm3, %v793_v39, %v992_v57  ;;  %v804_v24 = vpop.f32.mrb[11].mxu1 }
 0x296   : > { %4557 = vst [vmem:[#allocation29_spill] sm:$0xff] %v3726_v11  ;;  %vm951_vm9 = vcmp.ge.f32.partialorder %v795_v43, 0.0  ;;  %v993_v45 = vmul.f32 0.2, %v795_v43  ;;  %v3739_v44 = vpack.c.bf16 %v3670_v52, %v3657_v21  ;;  %2219 = vmatprep.subr.msk.bf16.mxu0 %vm3585_vm8, %v3726_v11  ;;  %v3752_v39 = vmul.f32 %v3551_v1, %v1034_v30  ;;  %v851_v56 = vpop.f32.mrb[16].mxu0 }
 0x297   : > { %vm931_vm13 = vcmp.ge.f32.partialorder %v842_v6, 0.0  ;;  %v973_v51 = vmul.f32 0.2, %v842_v6  ;;  %vm932_vm2 = vcmp.ge.f32.partialorder %v844_v13, 0.0  ;;  %2222 = vmatpush1.bf16.msk.msra.mxu0 %vm3605_vm11, %v2221_v4  ;;  %v974_v9 = vmul.f32 0.2, %v844_v13 }
 0x298   : > { %4560 = vst [vmem:[#allocation30_spill] sm:$0xff] %v3739_v44  ;;  %v1035_v57 = vsel %vm951_vm9, %v795_v43, %v993_v45  ;;  %2270 = vmatprep.subr.msk.bf16.mxu1 %vm3733_vm4, %v3739_v44  ;;  %v1186_v30 = vsel %vm3703_vm15, %v3645_v5, 0.0  ;;  %v1193_v42 = vsel %vm3703_vm15, %v3662_v31, 0.0  ;;  %v853_v38 = vpop.f32.mrb[17].mxu0  ;;  %v3770_v11 = vpack.c.bf16 %v3752_v39, %v3708_v54 }
 0x299   : > { %v3773_v4 = vmul.f32 %v3554_v2, %v1035_v57  ;;  %v1015_v43 = vsel %vm931_vm13, %v842_v6, %v973_v51  ;;  %v1228_v45 = vpack.c.bf16 %v1193_v42, %v1186_v30  ;;  %2273 = vmatpush1.bf16.msk.msra.mxu1 %vm3744_vm12, %v3667_v47  ;;  %v855_v26 = vpop.f32.mrb[18].mxu0  ;;  %v1016_v31 = vsel %vm932_vm2, %v844_v13, %v974_v9 }
 0x29a   : > { %v3779_v5 = vmul.f32 %v3578_v18, %v1015_v43  ;;  %v846_v44 = vadd.f32 %v845_v40, %v3527_v48  ;;  %v848_v36 = vadd.f32 %v847_v49, %v3527_v48  ;;  %v3784_v34 = vpop.f32.mrb[19].mxu0  ;;  %v3787_v57 = vmul.f32 %v3482_v27, %v1016_v31  ;;  %v3796_v40 = vpop.f32.mrb[12].mxu1 }
 0x29b   : > { %1266 = vrot.lane.b32.xlu0 %v1228_v45, %s2963_s4  ;;  %1320 = vrot.lane.b32.xlu1 %v1228_v45, %s2964_s14  ;;  %v799_v42 = vadd.f32 %v798_v37, %v3647_v15  ;;  %v801_v6 = vadd.f32 %v800_v61, %v3647_v15  ;;  %v1192_v9 = vsel %vm3558_vm6, %v3572_v10, 0.0  ;;  %v4565_v37 = vsel %vm3558_vm6, %v3548_v63, 0.0  ;;  %v2353_v31 = vpop.f32.mrb[13].mxu1 }
 0x29c   : > { %4563 = vst [vmem:[#allocation31_spill] sm:$0xff] %v3779_v5  ;;  %4564 = vst [vmem:[#allocation32_spill] sm:$0xff] %v3787_v57  ;;  %vm938_vm1 = vcmp.ge.f32.partialorder %v846_v44, 0.0  ;;  %v980_v49 = vmul.f32 0.2, %v846_v44  ;;  %vm939_vm3 = vcmp.ge.f32.partialorder %v848_v36, 0.0  ;;  %v1227_v61 = vpack.c.bf16 %v1192_v9, %v4565_v37 }
 0x29d   : > { %v981_v13 = vmul.f32 0.2, %v848_v36  ;;  %vm957_vm9 = vcmp.ge.f32.partialorder %v799_v42, 0.0  ;;  %v999_v51 = vmul.f32 0.2, %v799_v42  ;;  %vm958_vm13 = vcmp.ge.f32.partialorder %v801_v6, 0.0 }
 0x29e   : > { %v1000_v30 = vmul.f32 0.2, %v801_v6  ;;  %v1022_v43 = vsel %vm938_vm1, %v846_v44, %v980_v49  ;;  %v3804_v10 = vpack.c.bf16 %v3692_v50, %v3677_v60  ;;  %v861_v44 = vpop.f32.mrb[20].mxu0  ;;  %v856_v37 = vadd.f32 %v855_v26, %v3580_v20 }
 0x29f   : > { %v1023_v45 = vsel %vm939_vm3, %v848_v36, %v981_v13  ;;  %v3807_v47 = vmul.f32 %v3578_v18, %v1022_v43  ;;  %v1041_v5 = vsel %vm957_vm9, %v799_v42, %v999_v51  ;;  %1316 = vrot.lane.b32.xlu0 %v3610_v35, %s2964_s14  ;;  %v907_v36 = vpop.f32.mrb[14].mxu1  ;;  %1264 = vrot.lane.b32.xlu1 %v1227_v61, %s2963_s4  ;;  %v1187_v35 = vsel %vm3717_vm14, %v3657_v21, 0.0 }
 0x2a0   : > { %v3810_v57 = vmul.f32 %v3482_v27, %v1023_v45  ;;  %v1042_v55 = vsel %vm958_vm13, %v801_v6, %v1000_v30  ;;  %v3815_v63 = vmul.f32 %v3551_v1, %v1041_v5  ;;  %2225 = vmatprep.subr.msk.bf16.mxu0 %vm3585_vm8, %v3804_v10  ;;  %v803_v42 = vadd.f32 %v802_v25, %v3654_v19  ;;  %v863_v6 = vpop.f32.mrb[21].mxu0  ;;  %v2354_v49 = vpop.f32.mrb[15].mxu1 }
 0x2a1   : > { %v3818_v9 = vmul.f32 %v3554_v2, %v1042_v55  ;;  %v4566_v5 = vpack.c.bf16 %v3681_v17, %v3674_v58  ;;  %v805_v55 = vadd.f32 %v804_v24, %v3654_v19  ;;  %v852_v13 = vadd.f32 %v851_v56, %v3563_v7  ;;  %v3839_v30 = vpop.f32.mrb[22].mxu0 }
 0x2a2   : > { %v854_v51 = vadd.f32 %v853_v38, %v3563_v7  ;;  %v1194_v25 = vsel %vm3717_vm14, %v3670_v52, 0.0  ;;  %vm964_vm2 = vcmp.ge.f32.partialorder %v803_v42, 0.0  ;;  %v1006_v21 = vmul.f32 0.2, %v803_v42  ;;  %v3845_v28 = vpop.f32.mrb[23].mxu0  ;;  %v3853_v31 = vpop.f32.mrb[16].mxu1 }
 0x2a3   : > { %2228 = vmatpush1.bf16.msk.msra.mxu0 %vm3605_vm11, %v4566_v5  ;;  %v1229_v43 = vpack.c.bf16 %v1194_v25, %v1187_v35  ;;  %v3843_v45 = vpack.c.bf16 %v3773_v4, %v3722_v0  ;;  %vm965_vm11 = vcmp.ge.f32.partialorder %v805_v55, 0.0  ;;  %v1007_v24 = vmul.f32 0.2, %v805_v55  ;;  %1318 = vrot.lane.b32.xlu0 %v1227_v61, %s2964_s14 }
 0x2a4   : > { %vm945_vm1 = vcmp.ge.f32.partialorder %v852_v13, 0.0  ;;  %v987_v56 = vmul.f32 0.2, %v852_v13  ;;  %v1048_v38 = vsel %vm964_vm2, %v803_v42, %v1006_v21  ;;  %vm946_vm3 = vcmp.ge.f32.partialorder %v854_v51, 0.0  ;;  %v2357_v42 = vpop.f32.mrb[17].mxu1 }
 0x2a5   : > { %v988_v52 = vmul.f32 0.2, %v854_v51  ;;  %1268 = vrot.lane.b32.xlu1 %v1229_v43, %s2963_s4  ;;  %2276 = vmatprep.subr.msk.bf16.mxu1 %vm3733_vm4, %v3843_v45  ;;  %v3856_v35 = vmul.f32 %v3551_v1, %v1048_v38  ;;  %v1049_v49 = vsel %vm965_vm11, %v805_v55, %v1007_v24  ;;  %v858_v61 = vadd.f32 %v3784_v34, %v3580_v20  ;;  %v3869_v1 = vpop.f32.mrb[18].mxu1 }
 0x2a6   : > { %v1029_v5 = vsel %vm945_vm1, %v852_v13, %v987_v56  ;;  %2279 = vmatpush1.bf16.msk.msra.mxu1 %vm3744_vm12, %v3770_v11  ;;  %v3864_v25 = vmul.f32 %v3554_v2, %v1049_v49  ;;  %vm952_vm9 = vcmp.ge.f32.partialorder %v856_v37, 0.0  ;;  %v994_v24 = vmul.f32 0.2, %v856_v37  ;;  %v2358_v34 = vpop.f32.mrb[19].mxu1 }
 0x2a7   : > { %v3867_v26 = vmul.f32 %v3578_v18, %v1029_v5  ;;  %v1030_v21 = vsel %vm946_vm3, %v854_v51, %v988_v52  ;;  %v3873_v55 = vpack.c.bf16 %v3856_v35, %v3815_v63  ;;  %vm953_vm13 = vcmp.ge.f32.partialorder %v858_v61, 0.0  ;;  %1322 = vrot.lane.b32.xlu0 %v1229_v43, %s2964_s14 }
 0x2a8   : > { %v3876_v13 = vmul.f32 %v3482_v27, %v1030_v21  ;;  %v995_v2 = vmul.f32 0.2, %v858_v61  ;;  %v905_v56 = vadd.f32 %v3796_v40, %v3516_v41  ;;  %v1200_v51 = vsel %vm3703_vm15, %v3708_v54, 0.0 }
 0x2a9   : > { %v1207_v38 = vsel %vm3703_vm15, %v3752_v39, 0.0  ;;  %v1036_v52 = vsel %vm952_vm9, %v856_v37, %v994_v24  ;;  %v908_v5 = vadd.f32 %v907_v36, %v3527_v48  ;;  %v862_v43 = vadd.f32 %v861_v44, %v3647_v15 }
 0x2aa   : > { %v3887_v49 = vpack.c.bf16 %v1207_v38, %v1200_v51  ;;  %v3892_v42 = vmul.f32 %v3578_v18, %v1036_v52  ;;  %v1037_v21 = vsel %vm953_vm13, %v858_v61, %v995_v2  ;;  %vm933_vm2 = vcmp.ge.f32.partialorder %v905_v56, 0.0  ;;  %v920_v39 = vpop.f32.mrb[20].mxu1 }
 0x2ab   : > { %v975_v41 = vmul.f32 0.2, %v905_v56  ;;  %v3895_v40 = vmul.f32 %v3482_v27, %v1037_v21  ;;  %vm940_vm11 = vcmp.ge.f32.partialorder %v908_v5, 0.0  ;;  %v982_v54 = vmul.f32 0.2, %v908_v5  ;;  %v2361_v61 = vpop.f32.mrb[21].mxu1 }
 0x2ac   : > { %1276 = vrot.lane.b32.xlu1 %v3887_v49, %s2963_s4  ;;  %vm959_vm1 = vcmp.ge.f32.partialorder %v862_v43, 0.0  ;;  %v1001_v48 = vmul.f32 0.2, %v862_v43  ;;  %v864_v36 = vadd.f32 %v863_v6, %v3647_v15  ;;  %v1199_v44 = vsel %vm3558_vm6, %v3695_v53, 0.0  ;;  %v923_v53 = vpop.f32.mrb[22].mxu1 }
 0x2ad   : > { %v1017_v37 = vsel %vm933_vm2, %v905_v56, %v975_v41  ;;  %vm1073_vm3 = vcmp.ge.s32.totalorder %v3595_v12, %v3496_v32  ;;  %vm1081_vm9 = vcmp.lt.s32.totalorder %v3595_v12, %v3498_v33  ;;  %v1024_v34 = vsel %vm940_vm11, %v908_v5, %v982_v54  ;;  %v2362_v52 = vpop.f32.mrb[23].mxu1  ;;  %v4567_v41 = vld [vmem:[#allocation27_spill] sm:$0xff] }
 0x2ae   : > { %v3908_v24 = vmul.f32 %v3490_v29, %v1017_v37  ;;  %v1206_v2 = vsel %vm3558_vm6, %v3636_v59, 0.0  ;;  %v1198_v6 = vsel %vm3543_vm5, %v3623_v46, 0.0  ;;  %v3917_v56 = vmul.f32 %v3490_v29, %v1024_v34 }
 0x2af   : > { %v1043_v51 = vsel %vm959_vm1, %v862_v43, %v1001_v48  ;;  %vm960_vm13 = vcmp.ge.f32.partialorder %v864_v36, 0.0  ;;  %v1002_v38 = vmul.f32 0.2, %v864_v36  ;;  %v1234_v5 = vpack.c.bf16 %v1206_v2, %v1199_v44 }
 0x2b0   : > { %v3920_v21 = vmul.f32 %v3578_v18, %v1043_v51  ;;  %v1205_v59 = vsel %vm3543_vm5, %v4567_v41, 0.0  ;;  %v3927_v54 = vpack.c.bf16 %v3864_v25, %v3818_v9  ;;  %v866_v43 = vadd.f32 %v3839_v30, %v3654_v19 }
 0x2b1   : > { %v1044_v46 = vsel %vm960_vm13, %v864_v36, %v1002_v38  ;;  %v3929_v37 = vpack.c.bf16 %v1205_v59, %v1198_v6  ;;  %v868_v48 = vadd.f32 %v3845_v28, %v3654_v19  ;;  %1328 = vrot.lane.b32.xlu1 %v1234_v5, %s2964_s14  ;;  %v913_v36 = vadd.f32 %v3853_v31, %v3563_v7  ;;  %vm3996_vm13 = vmand %vm1073_vm3, %vm1081_vm9 }
 0x2b2   : > { %v3936_v61 = vmul.f32 %v3482_v27, %v1044_v46  ;;  %2282 = vmatprep.subr.msk.bf16.mxu1 %vm3733_vm4, %v3927_v54  ;;  %v1212_v44 = vsel %vm3543_vm5, %v3674_v58, 0.0  ;;  %v1219_v30 = vsel %vm3543_vm5, %v3681_v17, 0.0  ;;  %vm966_vm2 = vcmp.ge.f32.partialorder %v866_v43, 0.0 }
 0x2b3   : > { %1272 = vrot.lane.b32.xlu0 %v3929_v37, %s2963_s4  ;;  %v1008_v28 = vmul.f32 0.2, %v866_v43  ;;  %2285 = vmatpush1.bf16.msk.msra.mxu1 %vm3744_vm12, %v3873_v55  ;;  %vm967_vm11 = vcmp.ge.f32.partialorder %v868_v48, 0.0  ;;  %v1009_v34 = vmul.f32 0.2, %v868_v48  ;;  %vm947_vm1 = vcmp.ge.f32.partialorder %v913_v36, 0.0 }
 0x2b4   : > { %v989_v7 = vmul.f32 0.2, %v913_v36  ;;  %v3955_v31 = vpack.c.bf16 %v1219_v30, %v1212_v44  ;;  %v916_v58 = vadd.f32 %v3869_v1, %v3580_v20  ;;  %v1201_v2 = vsel %vm3717_vm14, %v3722_v0, 0.0  ;;  %v4571_v30 = vld [vmem:[#allocation32_spill] sm:$0xff] }
 0x2b5   : > { %v1050_v62 = vsel %vm966_vm2, %v866_v43, %v1008_v28  ;;  %v1051_v17 = vsel %vm967_vm11, %v868_v48, %v1009_v34  ;;  %v1208_v6 = vsel %vm3717_vm14, %v3773_v4, 0.0  ;;  %v921_v4 = vadd.f32 %v920_v39, %v3647_v15  ;;  %v4570_v39 = vld [vmem:[#allocation31_spill] sm:$0xff] }
 0x2b6   : > { %v3966_v51 = vmul.f32 %v3578_v18, %v1050_v62  ;;  %v3969_v38 = vmul.f32 %v3482_v27, %v1051_v17  ;;  %v1031_v52 = vsel %vm947_vm1, %v913_v36, %v989_v7  ;;  %1282 = vrot.lane.b32.xlu1 %v3955_v31, %s2963_s4  ;;  %vm954_vm5 = vcmp.ge.f32.partialorder %v916_v58, 0.0  ;;  %v2595_v28 = vld [vmem:[#allocation10 + $0x44] ss:$16 sps:$4 sm:$0xff]  }
 0x2b7   : > { %v1148_v20 = vmul.f32 %v3490_v29, %v1031_v52  ;;  %1274 = vrot.lane.b32.xlu0 %v1234_v5, %s2963_s4  ;;  %v996_v0 = vmul.f32 0.2, %v916_v58  ;;  %v3975_v1 = vpack.c.bf16 %v1208_v6, %v1201_v2  ;;  %v1213_v18 = vsel %vm3558_vm6, %v3677_v60, 0.0  ;;  %v4589_v60 = vld [vmem:[#allocation30_spill] sm:$0xff] }
 0x2b8   : > { %v1220_v27 = vsel %vm3558_vm6, %v3692_v50, 0.0  ;;  %v1214_v41 = vsel %vm3703_vm15, %v3815_v63, 0.0  ;;  %v1221_v5 = vsel %vm3703_vm15, %v3856_v35, 0.0  ;;  %v1215_v63 = vsel %vm3717_vm14, %v3818_v9, 0.0 }
 0x2b9   : > { %v1038_v3 = vsel %vm954_vm5, %v916_v58, %v996_v0  ;;  %v1241_v15 = vpack.c.bf16 %v1220_v27, %v1213_v18  ;;  %v1242_v50 = vpack.c.bf16 %v1221_v5, %v1214_v41  ;;  %vm961_vm6 = vcmp.ge.f32.partialorder %v921_v4, 0.0 }
 0x2ba   : > { %v1155_v23 = vmul.f32 %v3490_v29, %v1038_v3  ;;  %v1003_v35 = vmul.f32 0.2, %v921_v4  ;;  %v1222_v33 = vsel %vm3717_vm14, %v3864_v25, 0.0  ;;  %v924_v12 = vadd.f32 %v923_v53, %v3654_v19 }
 0x2bb   : > { %1278 = vrot.lane.b32.xlu0 %v3975_v1, %s2963_s4  ;;  %1284 = vrot.lane.b32.xlu1 %v1241_v15, %s2963_s4  ;;  %v1243_v32 = vpack.c.bf16 %v1222_v33, %v1215_v63  ;;  %v1188_v9 = vsel %vm3996_vm13, %v4570_v39, 0.0  ;;  %v1195_v59 = vsel %vm3996_vm13, %v3807_v47, 0.0  ;;  %v1202_v14 = vsel %vm3996_vm13, %v3867_v26, 0.0 }
 0x2bc   : > { %v1045_v46 = vsel %vm961_vm6, %v921_v4, %v1003_v35  ;;  %v1230_v43 = vpack.c.bf16 %v1195_v59, %v1188_v9  ;;  %v1209_v25 = vsel %vm3996_vm13, %v3892_v42, 0.0  ;;  %vm968_vm15 = vcmp.ge.f32.partialorder %v924_v12, 0.0 }
 0x2bd   : > { %v1162_v19 = vmul.f32 %v3490_v29, %v1045_v46  ;;  %v1010_v53 = vmul.f32 0.2, %v924_v12  ;;  %v1237_v48 = vpack.c.bf16 %v1209_v25, %v1202_v14  ;;  %v1216_v36 = vsel %vm3996_vm13, %v3920_v21, 0.0 }
 0x2be   : > { %v1223_v44 = vsel %vm3996_vm13, %v3966_v51, 0.0  ;;  %v1189_v34 = vsel %vm3502_vm7, %v4571_v30, 0.0  ;;  %v1196_v7 = vsel %vm3502_vm7, %v3810_v57, 0.0  ;;  %v1203_v2 = vsel %vm3502_vm7, %v3876_v13, 0.0 }
 0x2bf   : > { %1286 = vrot.lane.b32.xlu0 %v1242_v50, %s2963_s4  ;;  %1288 = vrot.lane.b32.xlu1 %v1243_v32, %s2963_s4  ;;  %v1052_v58 = vsel %vm968_vm15, %v924_v12, %v1010_v53  ;;  %v1244_v62 = vpack.c.bf16 %v1223_v44, %v1216_v36  ;;  %v1231_v17 = vpack.c.bf16 %v1196_v7, %v1189_v34  ;;  %v1210_v52 = vsel %vm3502_vm7, %v3895_v40, 0.0 }
 0x2c0   : > { %v1169_v6 = vmul.f32 %v3490_v29, %v1052_v58  ;;  %v1217_v0 = vsel %vm3502_vm7, %v3936_v61, 0.0  ;;  %v1224_v18 = vsel %vm3502_vm7, %v3969_v38, 0.0  ;;  %v1238_v27 = vpack.c.bf16 %v1210_v52, %v1203_v2 }
 0x2c1   : > { %v1245_v4 = vpack.c.bf16 %v1224_v18, %v1217_v0  ;;  %v1190_v5 = vsel %vm3509_vm10, %v3908_v24, 0.0  ;;  %v1197_v29 = vsel %vm3509_vm10, %v3917_v56, 0.0  ;;  %v1204_v63 = vsel %vm3509_vm10, %v1148_v20, 0.0 }
 0x2c2   : > { %v1232_v3 = vpack.c.bf16 %v1197_v29, %v1190_v5  ;;  %v1211_v35 = vsel %vm3509_vm10, %v1155_v23, 0.0  ;;  %v1218_v33 = vsel %vm3509_vm10, %v1162_v19, 0.0  ;;  %v1225_v24 = vsel %vm3509_vm10, %v1169_v6, 0.0 }
 0x2c3   : > { %1270 = vrot.lane.b32.xlu0 %v1230_v43, %s2963_s4  ;;  %1324 = vrot.lane.b32.xlu1 %v1230_v43, %s2964_s14  ;;  %v1239_v12 = vpack.c.bf16 %v1211_v35, %v1204_v63  ;;  %v4069_v56 = vpack.c.bf16 %v3807_v47, %v4570_v39  ;;  %v4073_v20 = vpack.c.bf16 %v3892_v42, %v3867_v26  ;;  %v2591_v47 = vld [vmem:[#allocation10 + $0x4] ss:$16 sps:$4 sm:$0xff]   ;;  %vm4574_vm10 = vcmask 1031168  }
 0x2c4   : > { %v1246_v23 = vpack.c.bf16 %v1225_v24, %v1218_v33  ;;  %v4077_v9 = vpack.c.bf16 %v3966_v51, %v3920_v21  ;;  %v2305_v59 = vpack.c.bf16 %v3810_v57, %v4571_v30  ;;  %v2311_v46 = vpack.c.bf16 %v3895_v40, %v3876_v13  ;;  %1697 = vmatprep.mubr.bf16.mxu1 %v2591_v47  ;;  %v1436_v26 = vld [vmem:[#allocation11] sm:$0xff]  ;;  %v1438_v42 = vld [vmem:[#allocation11 + $0x10] sm:$0xff]  ;;  %v1439_v21 = vld [vmem:[#allocation11 + $0x18] sm:$0xff] }
 0x2c5   : > { %v2317_v43 = vpack.c.bf16 %v3969_v38, %v3936_v61  ;;  %1571 = vmatprep.mubr.bf16.mxu0 %v2591_v47  ;;  %v1876_v51 = vld [vmem:[#allocation14] sm:$0x7]  ;;  %vm4575_vm14 = vmmov %vm4574_vm10  ;;  %v2600_v40 = vld [vmem:[#allocation10 + $0xc] ss:$16 sps:$4 sm:$0xff]  }
 0x2c6   : > { %vm4576_vm3 = vmmov %vm4574_vm10  ;;  %v2597_v57 = vld [vmem:[#allocation10 + $0x40] ss:$16 sps:$4 sm:$0xff]  }
 0x2c7   : > { %1330 = vrot.lane.b32.xlu0 %v3887_v49, %s2964_s14  ;;  %1280 = vrot.lane.b32.xlu1 %v1237_v48, %s2963_s4  ;;  %v1437_v49 = vld [vmem:[#allocation11 + $0x8] sm:$0xff]  ;;  %vm4577_vm9 = vmmov %vm4576_vm3 }
 0x2c8   : > { %vm4578_vm2 = vmmov %vm4576_vm3 }
 0x2c9   : > { %vm4579_vm11 = vmmov %vm4578_vm2 }
 0x2ca   : > { %vm4580_vm1 = vmmov %vm4578_vm2 }
 0x2cb   : > { %1290 = vrot.lane.b32.xlu0 %v1244_v62, %s2963_s4  ;;  %1332 = vrot.lane.b32.xlu1 %v3975_v1, %s2964_s14  ;;  %vm4581_vm5 = vmmov %vm4580_vm1 }
 0x2cc   : > { %vm4582_vm6 = vmmov %vm4580_vm1 }
 0x2cd   : > { %vm4583_vm15 = vmmov %vm4580_vm1 }
 0x2cf   : > { %1334 = vrot.lane.b32.xlu0 %v1237_v48, %s2964_s14  ;;  %1326 = vrot.lane.b32.xlu1 %v3929_v37, %s2964_s14  ;;  %v1440_v37 = vld [vmem:[#allocation11 + $0x20] sm:$0xff] }
 0x2d3   : > { %1338 = vrot.lane.b32.xlu0 %v1241_v15, %s2964_s14  ;;  %1340 = vrot.lane.b32.xlu1 %v1242_v50, %s2964_s14 }
 0x2d7   : > { %1342 = vrot.lane.b32.xlu0 %v1243_v32, %s2964_s14  ;;  %1344 = vrot.lane.b32.xlu1 %v1244_v62, %s2964_s14 }
 0x2db   : > { %1336 = vrot.lane.b32.xlu0 %v3955_v31, %s2964_s14  ;;  %1373 = vrot.lane.b32.xlu1 %v1231_v17, %s2963_s4  ;;  %v1441_v31 = vld [vmem:[#allocation11 + $0x28] sm:$0xff] }
 0x2df   : > { %1375 = vrot.lane.b32.xlu0 %v1238_v27, %s2963_s4  ;;  %1377 = vrot.lane.b32.xlu1 %v1245_v4, %s2963_s4 }
 0x2e3   : > { %1385 = vrot.lane.b32.xlu0 %v1231_v17, %s2964_s14  ;;  %1387 = vrot.lane.b32.xlu1 %v1238_v27, %s2964_s14 }
 0x2e7   : > { %1389 = vrot.lane.b32.xlu0 %v1245_v4, %s2964_s14  ;;  %1400 = vrot.lane.b32.xlu1 %v1232_v3, %s2963_s4 }
 0x2eb   : > { %1402 = vrot.lane.b32.xlu0 %v1239_v12, %s2963_s4  ;;  %1404 = vrot.lane.b32.xlu1 %v1246_v23, %s2963_s4  ;;  %s4602_s4 = sld [smem:[#allocation38_spill]] }
 0x2ef   : > { %1412 = vrot.lane.b32.xlu0 %v1232_v3, %s2964_s14  ;;  %1414 = vrot.lane.b32.xlu1 %v1239_v12, %s2964_s14 }
 0x2f3   : > { %1416 = vrot.lane.b32.xlu0 %v1246_v23, %s2964_s14  ;;  %1444 = vperm.xlu1 %2576, %v1436_v26   ;;  %s4427_s14 = scalar_lea.hbm %s4602_s4, %s2330_s3 }
 0x2f6   : > { %v1263_v1 = vpop.permute.xlu1 %1262 }
 0x2f7   : > { %1449 = vperm.xlu0 %2575, %v1437_v49   ;;  %1454 = vperm.xlu1 %2576, %v1438_v42  }
 0x2fb   : > { %1459 = vperm.xlu0 %2575, %v1439_v21   ;;  %1464 = vperm.xlu1 %2576, %v1440_v37  }
 0x2ff   : > { %1469 = vperm.xlu0 %2575, %v1441_v31   ;;  %1879 = vperm.xlu1 %2576, %v1876_v51  }
 0x30d   : > { %v1267_v15 = vpop.permute.xlu0 %1266  ;;  %v1321_v50 = vpop.permute.xlu1 %1320 }
 0x311   : > { %v1317_v32 = vpop.permute.xlu0 %1316  ;;  %v1265_v39 = vpop.permute.xlu1 %1264 }
 0x312   : > { %v1292_v14 = vsel %vm475_vm0, %v1263_v1, %v1265_v39  ;;  %v4114_v25 = vsel %vm475_vm0, %v1265_v39, %v1267_v15 }
 0x313   : > { %1545 = vmatprep.subr.bf16.mxu0 %v4114_v25 }
 0x314   : > { %1546 = vmatpush1.bf16.msra.mxu0 %v1292_v14 }
 0x315   : > { %v1319_v53 = vpop.permute.xlu0 %1318 }
 0x316   : > { %v4128_v4 = vsel %vm4574_vm10, %v1319_v53, %v1321_v50  ;;  %v1346_v3 = vsel %vm4575_vm14, %v1317_v32, %v1319_v53  ;;  %vm4584_vm10 = vmmov %vm4580_vm1 }
 0x317   : > { %v1269_v19 = vpop.permute.xlu1 %1268  ;;  %vm4196_vm14 = vmpackc.low %vm3996_vm13, %vm3996_vm13 }
 0x318   : > { %v4138_v63 = vsel %vm475_vm0, %v1267_v15, %v1269_v19  ;;  %vm4593_vm13 = vmmov %vm4580_vm1 }
 0x319   : > { %v1323_v36 = vpop.permute.xlu0 %1322 }
 0x31a   : > { %v4171_v1 = vsel %vm4579_vm11, %v1321_v50, %v1323_v36 }
 0x31e   : > { %v1277_v48 = vpop.permute.xlu1 %1276 }
 0x323   : > { %v1329_v44 = vpop.permute.xlu1 %1328 }
 0x325   : > { %v1273_v34 = vpop.permute.xlu0 %1272 }
 0x328   : > { %v1283_v7 = vpop.permute.xlu1 %1282 }
 0x329   : > { %v1275_v58 = vpop.permute.xlu0 %1274 }
 0x32a   : > { %v1296_v62 = vsel %vm475_vm0, %v1273_v34, %v1275_v58  ;;  %v4119_v17 = vsel %vm475_vm0, %v1275_v58, %v1277_v48  ;;  %v4588_v58 = vld [vmem:[#allocation28_spill] sm:$0xff] }
 0x32b   : > { %1547 = vmatprep.subr.bf16.mxu0 %v4119_v17 }
 0x32c   : > { %1548 = vmatpush1.bf16.msra.mxu0 %v1296_v62  ;;  %v4590_v62 = vld [vmem:[#allocation26_spill] sm:$0xff] }
 0x32d   : > { %v1279_v2 = vpop.permute.xlu0 %1278  ;;  %v1285_v6 = vpop.permute.xlu1 %1284 }
 0x32e   : > { %v1300_v27 = vsel %vm475_vm0, %v1283_v7, %v1285_v6  ;;  %v4149_v23 = vsel %vm475_vm0, %v1277_v48, %v1279_v2 }
 0x331   : > { %v1287_v52 = vpop.permute.xlu0 %1286  ;;  %v1289_v0 = vpop.permute.xlu1 %1288 }
 0x332   : > { %v4123_v18 = vsel %vm475_vm0, %v1285_v6, %v1287_v52  ;;  %v4158_v42 = vsel %vm475_vm0, %v1287_v52, %v1289_v0  ;;  %v4591_v6 = vld [vmem:[#allocation29_spill] sm:$0xff] }
 0x333   : > { %1549 = vmatprep.subr.bf16.mxu0 %v4123_v18 }
 0x334   : > { %1550 = vmatpush1.bf16.msra.mxu0 %v1300_v27 }
 0x335   : > { %v1271_v41 = vpop.permute.xlu0 %1270  ;;  %1551 = vmatprep.subr.bf16.mxu0 %v4128_v4  ;;  %v4131_v5 = vpop.permute.xlu1 %1324 }
 0x336   : > { %v4134_v29 = vsel %vm475_vm0, %v1269_v19, %v1271_v41  ;;  %v4164_v21 = vsel %vm4577_vm9, %v1323_v36, %v4131_v5  ;;  %vm4594_vm9 = vmmov %vm4580_vm1 }
 0x337   : > { %1671 = vmatprep.subr.bf16.mxu1 %v4134_v29 }
 0x338   : > { %1552 = vmatpush1.bf16.msra.mxu0 %v1346_v3  ;;  %1672 = vmatpush1.bf16.msra.mxu1 %v4138_v63 }
 0x339   : > { %v1331_v35 = vpop.permute.xlu0 %1330  ;;  %v1281_v33 = vpop.permute.xlu1 %1280 }
 0x33a   : > { %v4143_v12 = vsel %vm4576_vm3, %v1329_v44, %v1331_v35  ;;  %v4146_v24 = vsel %vm475_vm0, %v1279_v2, %v1281_v33  ;;  %vm4587_vm3 = vmmov %vm4580_vm1 }
 0x33b   : > { %1553 = vmatprep.subr.bf16.mxu0 %v4143_v12  ;;  %1673 = vmatprep.subr.bf16.mxu1 %v4146_v24 }
 0x33c   : > { %1674 = vmatpush1.bf16.msra.mxu1 %v4149_v23 }
 0x33d   : > { %v1291_v47 = vpop.permute.xlu0 %1290  ;;  %v1333_v26 = vpop.permute.xlu1 %1332 }
 0x33e   : > { %v4155_v49 = vsel %vm475_vm0, %v1289_v0, %v1291_v47  ;;  %v4183_v19 = vsel %vm4582_vm6, %v1331_v35, %v1333_v26  ;;  %v2589_v35 = vld [vmem:[#allocation10] ss:$16 sps:$4 sm:$0xff]  }
 0x33f   : > { %1675 = vmatprep.subr.bf16.mxu1 %v4155_v49 }
 0x340   : > { %1676 = vmatpush1.bf16.msra.mxu1 %v4158_v42 }
 0x341   : > { %v4166_v37 = vpop.permute.xlu0 %1334  ;;  %1677 = vmatprep.subr.bf16.mxu1 %v4164_v21  ;;  %v1327_v31 = vpop.permute.xlu1 %1326 }
 0x342   : > { %v1350_v51 = vsel %vm4578_vm2, %v1327_v31, %v1329_v44  ;;  %v4176_v15 = vsel %vm4580_vm1, %v1333_v26, %v4166_v37  ;;  %vm4300_vm2 = vmpackc.low %vm3502_vm7, %vm3502_vm7  ;;  %vm1529_vm7 = vcmask 392192  }
 0x343   : > { %1554 = vmatpush1.bf16.msra.mxu0 %v1350_v51 }
 0x344   : > { %1678 = vmatpush1.bf16.msra.mxu1 %v4171_v1 }
 0x345   : > { %v1339_v32 = vpop.permute.xlu0 %1338  ;;  %1679 = vmatprep.subr.bf16.mxu1 %v4176_v15  ;;  %v1341_v39 = vpop.permute.xlu1 %1340 }
 0x346   : > { %v4180_v14 = vsel %vm4581_vm5, %v1339_v32, %v1341_v39 }
 0x347   : > { %1555 = vmatprep.subr.bf16.mxu0 %v4180_v14 }
 0x348   : > { %1680 = vmatpush1.bf16.msra.mxu1 %v4183_v19 }
 0x349   : > { %v1343_v50 = vpop.permute.xlu0 %1342  ;;  %v1345_v53 = vpop.permute.xlu1 %1344 }
 0x34a   : > { %v4188_v48 = vsel %vm4583_vm15, %v1341_v39, %v1343_v50  ;;  %v4191_v36 = vsel %vm4584_vm10, %v1343_v50, %v1345_v53 }
 0x34b   : > { %1681 = vmatprep.subr.bf16.mxu1 %v4191_v36 }
 0x34c   : > { %1682 = vmatpush1.bf16.msra.mxu1 %v4188_v48 }
 0x34d   : > { %v1337_v34 = vpop.permute.xlu0 %1336  ;;  %2288 = vmatprep.subr.msk.bf16.mxu1 %vm4196_vm14, %v4069_v56  ;;  %v4224_v2 = vpop.permute.xlu1 %1373 }
 0x34e   : > { %v1354_v7 = vsel %vm4587_vm3, %v1337_v34, %v1339_v32  ;;  %v4240_v52 = vsel %vm475_vm0, %v1271_v41, %v4224_v2 }
 0x34f   : > { %1556 = vmatpush1.bf16.msra.mxu0 %v1354_v7 }
 0x350   : > { %2231 = vmatprep.subr.msk.bf16.mxu0 %vm3744_vm12, %v4588_v58  ;;  %2291 = vmatpush1.bf16.msk.msra.mxu1 %vm3733_vm4, %v4589_v60 }
 0x351   : > { %2294 = vmatprep.subr.msk.bf16.mxu1 %vm4196_vm14, %v4073_v20  ;;  %v4242_v0 = vpop.permute.xlu0 %1375  ;;  %v4254_v3 = vpop.permute.xlu1 %1377 }
 0x352   : > { %v4252_v27 = vsel %vm475_vm0, %v1281_v33, %v4242_v0  ;;  %v4262_v22 = vsel %vm475_vm0, %v1291_v47, %v4254_v3 }
 0x353   : > { %2234 = vmatpush1.bf16.msk.msra.mxu0 %vm3585_vm8, %v4590_v62 }
 0x354   : > { %2237 = vmatprep.subr.msk.bf16.mxu0 %vm3744_vm12, %v3770_v11  ;;  %2297 = vmatpush1.bf16.msk.msra.mxu1 %vm3733_vm4, %v3843_v45 }
 0x355   : > { %2300 = vmatprep.subr.msk.bf16.mxu1 %vm4196_vm14, %v4077_v9  ;;  %v4275_v41 = vpop.permute.xlu1 %1387 }
 0x357   : > { %2240 = vmatpush1.bf16.msk.msra.mxu0 %vm3585_vm8, %v4591_v6 }
 0x358   : > { %2243 = vmatprep.subr.msk.bf16.mxu0 %vm3744_vm12, %v3873_v55  ;;  %2303 = vmatpush1.bf16.msk.msra.mxu1 %vm3733_vm4, %v3927_v54 }
 0x359   : > { %1689 = vmatprep.subr.bf16.mxu1 %v4240_v52  ;;  %v1401_v13 = vpop.permute.xlu1 %1400 }
 0x35b   : > { %2246 = vmatpush1.bf16.msk.msra.mxu0 %vm3585_vm8, %v3804_v10  ;;  %v4264_v10 = vpop.permute.xlu0 %1385  ;;  %vm4592_vm8 = vmmov %vm4580_vm1 }
 0x35c   : > { %1563 = vmatprep.subr.bf16.mxu0 %v4138_v63  ;;  %1690 = vmatpush1.bf16.msra.mxu1 %v4134_v29 }
 0x35d   : > { %1691 = vmatprep.subr.bf16.mxu1 %v4252_v27  ;;  %v1405_v8 = vpop.permute.xlu1 %1404 }
 0x35e   : > { %v1408_v16 = vsel %vm475_vm0, %v4254_v3, %v1405_v8 }
 0x35f   : > { %1564 = vmatpush1.bf16.msra.mxu0 %v4114_v25  ;;  %v4273_v25 = vsel %vm4592_vm8, %v4131_v5, %v4264_v10  ;;  %v4286_v33 = vpop.permute.xlu0 %1389  ;;  %v2592_v5 = vld [vmem:[#allocation10 + $0x24] ss:$16 sps:$4 sm:$0xff]  }
 0x360   : > { %1565 = vmatprep.subr.bf16.mxu0 %v4149_v23  ;;  %1692 = vmatpush1.bf16.msra.mxu1 %v4146_v24 }
 0x361   : > { %1693 = vmatprep.subr.bf16.mxu1 %v4262_v22  ;;  %v1415_v38 = vpop.permute.xlu1 %1414 }
 0x363   : > { %1566 = vmatpush1.bf16.msra.mxu0 %v4119_v17  ;;  %v4284_v17 = vsel %vm4593_vm13, %v4166_v37, %v4275_v41  ;;  %v1403_v61 = vpop.permute.xlu0 %1402 }
 0x364   : > { %1567 = vmatprep.subr.bf16.mxu0 %v4158_v42  ;;  %1694 = vmatpush1.bf16.msra.mxu1 %v4155_v49 }
 0x365   : > { %1695 = vmatprep.subr.bf16.mxu1 %v4273_v25 }
 0x367   : > { %1568 = vmatpush1.bf16.msra.mxu0 %v4123_v18  ;;  %v4294_v18 = vsel %vm4594_vm9, %v1345_v53, %v4286_v33 }
 0x368   : > { %1569 = vmatprep.subr.bf16.mxu0 %v4171_v1  ;;  %1696 = vmatpush1.bf16.msra.mxu1 %v4164_v21 }
 0x369   : > { %1728 = vmatprep.subr.bf16.mxu1 %v4284_v17 }
 0x36b   : > { %1570 = vmatpush1.bf16.msra.mxu0 %v4128_v4  ;;  %1698 = vmatmul.mubr.bf16.vlgmr.msra.gmra.mrb[24].mxu1 %v2589_v35  ;;  %v2594_v4 = vld [vmem:[#allocation10 + $0x20] ss:$16 sps:$4 sm:$0xff]  }
 0x36c   : > { %1602 = vmatprep.subr.bf16.mxu0 %v4183_v19  ;;  %1729 = vmatpush1.bf16.msra.mxu1 %v4176_v15 }
 0x36d   : > { %1730 = vmatprep.subr.bf16.mxu1 %v4294_v18  ;;  %1707 = vmatprep.mubr.bf16.mxu1 %v2592_v5 }
 0x36e   : > { %1572 = vmatmul.mubr.bf16.vlgmr.msra.gmra.mrb[24].mxu0 %v2589_v35 }
 0x36f   : > { %1603 = vmatpush1.bf16.msra.mxu0 %v4143_v12  ;;  %1581 = vmatprep.mubr.bf16.mxu0 %v2592_v5 }
 0x370   : > { %1604 = vmatprep.subr.bf16.mxu0 %v4188_v48  ;;  %1731 = vmatpush1.bf16.msra.mxu1 %v4191_v36 }
 0x371   : > { %2306 = vmatprep.subr.msk.bf16.mxu1 %vm4300_vm2, %v2305_v59  ;;  %v2601_v59 = vld [vmem:[#allocation10 + $0x2c] ss:$16 sps:$4 sm:$0xff]  }
 0x372   : > { %v1445_v12 = vpop.permute.xlu1 %1444 }
 0x373   : > { %1605 = vmatpush1.bf16.msra.mxu0 %v4180_v14  ;;  %1708 = vmatmul.mubr.bf16.gmra.mrb[28].mxu1 %v2594_v4 }
 0x374   : > { %2249 = vmatprep.subr.msk.bf16.mxu0 %vm3733_vm4, %v4589_v60  ;;  %2309 = vmatpush1.bf16.msk.msra.mxu1 %vm4196_vm14, %v4069_v56 }
 0x375   : > { %2312 = vmatprep.subr.msk.bf16.mxu1 %vm4300_vm2, %v2311_v46  ;;  %1717 = vmatprep.mubr.bf16.mxu1 %v2595_v28  ;;  %v2603_v46 = vld [vmem:[#allocation10 + $0x28] ss:$16 sps:$4 sm:$0xff]  }
 0x376   : > { %1582 = vmatmul.mubr.bf16.gmra.mrb[28].mxu0 %v2594_v4  ;;  %v1455_v60 = vpop.permute.xlu1 %1454 }
 0x377   : > { %2252 = vmatpush1.bf16.msk.msra.mxu0 %vm3744_vm12, %v4588_v58  ;;  %1591 = vmatprep.mubr.bf16.mxu0 %v2595_v28 }
 0x378   : > { %2255 = vmatprep.subr.msk.bf16.mxu0 %vm3733_vm4, %v3843_v45  ;;  %2315 = vmatpush1.bf16.msk.msra.mxu1 %vm4196_vm14, %v4073_v20  ;;  %v1406_v45 = vsel %vm475_vm0, %v4224_v2, %v1401_v13 }
 0x379   : > { %2318 = vmatprep.subr.msk.bf16.mxu1 %vm4300_vm2, %v2317_v43  ;;  %v2604_v43 = vld [vmem:[#allocation10 + $0x4c] ss:$16 sps:$4 sm:$0xff]  }
 0x37b   : > { %2258 = vmatpush1.bf16.msk.msra.mxu0 %vm3744_vm12, %v3770_v11  ;;  %1718 = vmatmul.mubr.bf16.gmra.mrb[32].mxu1 %v2597_v57  ;;  %v1407_v11 = vsel %vm475_vm0, %v4242_v0, %v1403_v61  ;;  %vm4598_vm0 = vmmov %vm4580_vm1 }
 0x37c   : > { %2261 = vmatprep.subr.msk.bf16.mxu0 %vm3733_vm4, %v3927_v54  ;;  %2321 = vmatpush1.bf16.msk.msra.mxu1 %vm4196_vm14, %v4077_v9  ;;  %vm4597_vm4 = vmmov %vm4580_vm1  ;;  %v1419_v30 = vsel %vm4598_vm0, %v4275_v41, %v1415_v38  ;;  %v2598_v9 = vld [vmem:[#allocation10 + $0x8] ss:$16 sps:$4 sm:$0xff]  }
 0x37d   : > { %1738 = vmatprep.subr.bf16.mxu1 %v1406_v45  ;;  %2322 = vmatprep.mubr.msk.bf16.mxu1 %vm1529_vm7, %v2600_v40 }
 0x37e   : > { %1592 = vmatmul.mubr.bf16.gmra.mrb[32].mxu0 %v2597_v57 }
 0x37f   : > { %2264 = vmatpush1.bf16.msk.msra.mxu0 %vm3744_vm12, %v3873_v55  ;;  %2265 = vmatprep.mubr.msk.bf16.mxu0 %vm1529_vm7, %v2600_v40  ;;  %v1413_v55 = vpop.permute.xlu0 %1412  ;;  %vm4599_vm12 = vmmov %vm4598_vm0 }
 0x380   : > { %1612 = vmatprep.subr.bf16.mxu0 %v4134_v29  ;;  %1739 = vmatpush1.bf16.msra.mxu1 %v4240_v52  ;;  %v1418_v54 = vsel %vm4597_vm4, %v4264_v10, %v1413_v55  ;;  %v2606_v29 = vld [vmem:[#allocation10 + $0x48] ss:$16 sps:$4 sm:$0xff]  }
 0x381   : > { %1740 = vmatprep.subr.bf16.mxu1 %v1407_v11 }
 0x383   : > { %1613 = vmatpush1.bf16.msra.mxu0 %v4138_v63  ;;  %v1417_v56 = vpop.permute.xlu0 %1416  ;;  %v4600_v63 = vmov 0  }
 0x384   : > { %1614 = vmatprep.subr.bf16.mxu0 %v4146_v24  ;;  %1741 = vmatpush1.bf16.msra.mxu1 %v4252_v27  ;;  %v1420_v20 = vsel %vm4599_vm12, %v4286_v33, %v1417_v56 }
 0x385   : > { %1742 = vmatprep.subr.bf16.mxu1 %v1408_v16 }
 0x387   : > { %1615 = vmatpush1.bf16.msra.mxu0 %v4149_v23 }
 0x388   : > { %1616 = vmatprep.subr.bf16.mxu0 %v4155_v49  ;;  %1743 = vmatpush1.bf16.msra.mxu1 %v4262_v22  ;;  %v1450_v49 = vpop.permute.xlu0 %1449 }
 0x389   : > { %1744 = vmatprep.subr.bf16.mxu1 %v1418_v54 }
 0x38b   : > { %1617 = vmatpush1.bf16.msra.mxu0 %v4158_v42 }
 0x38c   : > { %1618 = vmatprep.subr.bf16.mxu0 %v4164_v21  ;;  %1745 = vmatpush1.bf16.msra.mxu1 %v4273_v25  ;;  %v1460_v25 = vpop.permute.xlu0 %1459 }
 0x38d   : > { %1746 = vmatprep.subr.bf16.mxu1 %v1419_v30 }
 0x38f   : > { %1619 = vmatpush1.bf16.msra.mxu0 %v4171_v1 }
 0x390   : > { %1620 = vmatprep.subr.bf16.mxu0 %v4176_v15  ;;  %1747 = vmatpush1.bf16.msra.mxu1 %v4284_v17 }
 0x391   : > { %1748 = vmatprep.subr.bf16.mxu1 %v1420_v20 }
 0x393   : > { %1621 = vmatpush1.bf16.msra.mxu0 %v4183_v19 }
 0x394   : > { %1622 = vmatprep.subr.bf16.mxu0 %v4191_v36  ;;  %1749 = vmatpush1.bf16.msra.mxu1 %v4294_v18 }
 0x397   : > { %1623 = vmatpush1.bf16.msra.mxu0 %v4188_v48  ;;  %1761 = vmatmul.mubr.bf16.vlgmr.msra.gmra.mrb[24].mxu1 %v2598_v9 }
 0x398   : > { %2323 = vmatprep.mubr.msk.bf16.mxu1 %vm1529_vm7, %v2601_v59 }
 0x39a   : > { %1635 = vmatmul.mubr.bf16.vlgmr.msra.gmra.mrb[24].mxu0 %v2598_v9 }
 0x39b   : > { %2266 = vmatprep.mubr.msk.bf16.mxu0 %vm1529_vm7, %v2601_v59 }
 0x39f   : > { %1771 = vmatmul.mubr.bf16.gmra.mrb[28].mxu1 %v2603_v46 }
 0x3a0   : > { %2324 = vmatprep.mubr.msk.bf16.mxu1 %vm1529_vm7, %v2604_v43 }
 0x3a2   : > { %1645 = vmatmul.mubr.bf16.gmra.mrb[28].mxu0 %v2603_v46 }
 0x3a3   : > { %2267 = vmatprep.mubr.msk.bf16.mxu0 %vm1529_vm7, %v2604_v43 }
 0x3a7   : > { %1781 = vmatmul.mubr.bf16.gmra.mrb[32].mxu1 %v2606_v29 }
 0x3a8   : > { %1958 = vmatprep.mubr.bf16.mxu1 %v4600_v63 }
 0x3aa   : > { %1655 = vmatmul.mubr.bf16.gmra.mrb[32].mxu0 %v2606_v29 }
 0x3ab   : > { %1917 = vmatprep.mubr.bf16.mxu0 %v4600_v63  ;;  %v1465_v63 = vpop.permute.xlu1 %1464 }
 0x46a   : > { %v1762_v24 = vpop.f32.mrb[24].mxu1 }
 0x46b   : > { %v2375_v23 = vadd.f32 %v1762_v24, %v1445_v12  ;;  %v1764_v26 = vpop.f32.mrb[25].mxu1 }
 0x46c   : > { %v2376_v42 = vadd.f32 %v1764_v26, %v1445_v12  ;;  %v1766_v21 = vpop.f32.mrb[26].mxu1 }
 0x46d   : > { %vm1793_vm11 = vcmp.ge.f32.partialorder %v2375_v23, 0.0  ;;  %v1817_v37 = vmul.f32 0.2, %v2375_v23  ;;  %v2377_v31 = vadd.f32 %v1766_v21, %v1450_v49  ;;  %v1636_v51 = vpop.f32.mrb[24].mxu0  ;;  %v1768_v1 = vpop.f32.mrb[27].mxu1 }
 0x46e   : > { %v1818_v15 = vmul.f32 0.2, %v2376_v42  ;;  %v2363_v32 = vadd.f32 %v1636_v51, %v1445_v12  ;;  %v2378_v39 = vadd.f32 %v1768_v1, %v1450_v49  ;;  %v1638_v14 = vpop.f32.mrb[25].mxu0  ;;  %vm1794_vm1 = vcmp.ge.f32.partialorder %v2376_v42, 0.0 }
 0x46f   : > { %vm1797_vm5 = vcmp.ge.f32.partialorder %v2377_v31, 0.0  ;;  %v1821_v19 = vmul.f32 0.2, %v2377_v31  ;;  %v4388_v50 = vadd.f32 %v1638_v14, %v1445_v12  ;;  %v1640_v53 = vpop.f32.mrb[26].mxu0  ;;  %v1841_v48 = vsel %vm1793_vm11, %v2375_v23, %v1817_v37  ;;  %v1470_v23 = vpop.permute.xlu0 %1469 }
 0x470   : > { %v1815_v36 = vmul.f32 0.2, %v2363_v32  ;;  %vm1798_vm6 = vcmp.ge.f32.partialorder %v2378_v39, 0.0  ;;  %v1822_v44 = vmul.f32 0.2, %v2378_v39  ;;  %vm1791_vm15 = vcmp.ge.f32.partialorder %v2363_v32, 0.0 }
 0x471   : > { %v1845_v34 = vsel %vm1797_vm5, %v2377_v31, %v1821_v19  ;;  %vm1792_vm10 = vcmp.ge.f32.partialorder %v4388_v50, 0.0  ;;  %v2365_v7 = vadd.f32 %v1640_v53, %v1450_v49  ;;  %v1642_v58 = vpop.f32.mrb[27].mxu0  ;;  %v1816_v2 = vmul.f32 0.2, %v4388_v50 }
 0x472   : > { %v1866_v62 = vpack.c.bf16 %v1845_v34, %v1841_v48  ;;  %v2366_v6 = vadd.f32 %v1642_v58, %v1450_v49  ;;  %v1772_v52 = vpop.f32.mrb[28].mxu1  ;;  %v1842_v0 = vsel %vm1794_vm1, %v2376_v42, %v1818_v15  ;;  %v1846_v10 = vsel %vm1798_vm6, %v2378_v39, %v1822_v44 }
 0x473   : > { %vm1795_vm14 = vcmp.ge.f32.partialorder %v2365_v7, 0.0  ;;  %v1819_v27 = vmul.f32 0.2, %v2365_v7  ;;  %v2379_v3 = vadd.f32 %v1772_v52, %v1455_v60  ;;  %v1774_v22 = vpop.f32.mrb[29].mxu1  ;;  %v4395_v41 = vsel %vm1791_vm15, %v2363_v32, %v1815_v36 }
 0x474   : > { %vm1796_vm3 = vcmp.ge.f32.partialorder %v2366_v6, 0.0  ;;  %v4397_v35 = vadd.f32 %v1774_v22, %v1455_v60  ;;  %v1776_v17 = vpop.f32.mrb[30].mxu1  ;;  %v1867_v33 = vpack.c.bf16 %v1846_v10, %v1842_v0  ;;  %v1820_v18 = vmul.f32 0.2, %v2366_v6 }
 0x475   : > { %v1843_v5 = vsel %vm1795_vm14, %v2365_v7, %v1819_v27  ;;  %v1825_v47 = vmul.f32 0.2, %v2379_v3  ;;  %v2381_v4 = vadd.f32 %v1776_v17, %v1460_v25  ;;  %v1646_v28 = vpop.f32.mrb[28].mxu0  ;;  %v1778_v57 = vpop.f32.mrb[31].mxu1  ;;  %vm1801_vm8 = vcmp.ge.f32.partialorder %v2379_v3, 0.0 }
 0x476   : > { %v1864_v13 = vpack.c.bf16 %v1843_v5, %v4395_v41  ;;  %vm1802_vm13 = vcmp.ge.f32.partialorder %v4397_v35, 0.0  ;;  %v2367_v40 = vadd.f32 %v1646_v28, %v1455_v60  ;;  %1926 = vmatprep.subr.bf16.mxu1 %v1867_v33  ;;  %v1648_v45 = vpop.f32.mrb[29].mxu0  ;;  %v1826_v61 = vmul.f32 0.2, %v4397_v35 }
 0x477   : > { %vm1805_vm9 = vcmp.ge.f32.partialorder %v2381_v4, 0.0  ;;  %v1829_v11 = vmul.f32 0.2, %v2381_v4  ;;  %v2382_v8 = vadd.f32 %v1778_v57, %v1460_v25  ;;  %1927 = vmatpush1.bf16.msra.mxu1 %v1866_v62  ;;  %v1650_v16 = vpop.f32.mrb[30].mxu0  ;;  %v2368_v54 = vadd.f32 %v1648_v45, %v1455_v60 }
 0x478   : > { %vm1799_vm2 = vcmp.ge.f32.partialorder %v2367_v40, 0.0  ;;  %v1823_v55 = vmul.f32 0.2, %v2367_v40  ;;  %v2369_v38 = vadd.f32 %v1650_v16, %v1460_v25  ;;  %v1652_v30 = vpop.f32.mrb[31].mxu0  ;;  %v1849_v56 = vsel %vm1801_vm8, %v2379_v3, %v1825_v47  ;;  %v1880_v16 = vpop.permute.xlu1 %1879 }
 0x479   : > { %v1853_v20 = vsel %vm1805_vm9, %v2381_v4, %v1829_v11  ;;  %v1830_v9 = vmul.f32 0.2, %v2382_v8  ;;  %v2370_v59 = vadd.f32 %v1652_v30, %v1460_v25  ;;  %vm1806_vm4 = vcmp.ge.f32.partialorder %v2382_v8, 0.0 }
 0x47a   : > { %v1870_v46 = vpack.c.bf16 %v1853_v20, %v1849_v56  ;;  %v4403_v43 = vsel %vm1799_vm2, %v2367_v40, %v1823_v55  ;;  %vm1800_vm0 = vcmp.ge.f32.partialorder %v2368_v54, 0.0  ;;  %v1782_v29 = vpop.f32.mrb[32].mxu1  ;;  %v1824_v12 = vmul.f32 0.2, %v2368_v54 }
 0x47b   : > { %vm1803_vm12 = vcmp.ge.f32.partialorder %v2369_v38, 0.0  ;;  %v1827_v24 = vmul.f32 0.2, %v2369_v38  ;;  %vm1804_vm11 = vcmp.ge.f32.partialorder %v2370_v59, 0.0  ;;  %v1828_v26 = vmul.f32 0.2, %v2370_v59 }
 0x47c   : > { %v1840_v49 = vsel %vm1792_vm10, %v4388_v50, %v1816_v2  ;;  %v1844_v42 = vsel %vm1796_vm3, %v2366_v6, %v1820_v18  ;;  %v2383_v21 = vadd.f32 %v1782_v29, %v1465_v63  ;;  %v1784_v37 = vpop.f32.mrb[33].mxu1  ;;  %v1854_v39 = vsel %vm1806_vm4, %v2382_v8, %v1830_v9  ;;  %v1863_v8 = vld [vmem:[#allocation13] sm:$0x3] }
 0x47d   : > { %v1851_v31 = vsel %vm1803_vm12, %v2369_v38, %v1827_v24  ;;  %v1865_v51 = vpack.c.bf16 %v1844_v42, %v1840_v49  ;;  %v2384_v1 = vadd.f32 %v1784_v37, %v1465_v63  ;;  %v1786_v15 = vpop.f32.mrb[34].mxu1  ;;  %v1656_v32 = vpop.f32.mrb[32].mxu0  ;;  %v1850_v34 = vsel %vm1802_vm13, %v4397_v35, %v1826_v61 }
 0x47e   : > { %v1868_v14 = vpack.c.bf16 %v1851_v31, %v4403_v43  ;;  %vm1809_vm1 = vcmp.ge.f32.partialorder %v2383_v21, 0.0  ;;  %v1833_v19 = vmul.f32 0.2, %v2383_v21  ;;  %v2385_v53 = vadd.f32 %v1786_v15, %v1470_v23  ;;  %v1788_v48 = vpop.f32.mrb[35].mxu1  ;;  %v1658_v36 = vpop.f32.mrb[33].mxu0 }
 0x47f   : > { %1885 = vmatprep.subr.bf16.mxu0 %v1865_v51  ;;  %vm1810_vm5 = vcmp.ge.f32.partialorder %v2384_v1, 0.0  ;;  %v2371_v50 = vadd.f32 %v1656_v32, %v1465_v63  ;;  %v2386_v44 = vadd.f32 %v1788_v48, %v1470_v23  ;;  %v1660_v7 = vpop.f32.mrb[34].mxu0  ;;  %v1834_v58 = vmul.f32 0.2, %v2384_v1 }
 0x480   : > { %1886 = vmatpush1.bf16.msra.mxu0 %v1864_v13  ;;  %vm1813_vm6 = vcmp.ge.f32.partialorder %v2385_v53, 0.0  ;;  %v1837_v60 = vmul.f32 0.2, %v2385_v53  ;;  %v1871_v62 = vpack.c.bf16 %v1854_v39, %v1850_v34  ;;  %v1662_v2 = vpop.f32.mrb[35].mxu0  ;;  %v1857_v6 = vsel %vm1809_vm1, %v2383_v21, %v1833_v19 }
 0x481   : > { %vm1807_vm15 = vcmp.ge.f32.partialorder %v2371_v50, 0.0  ;;  %v1831_v52 = vmul.f32 0.2, %v2371_v50  ;;  %v1838_v0 = vmul.f32 0.2, %v2386_v44  ;;  %v2372_v3 = vadd.f32 %v1658_v36, %v1465_v63 }
 0x482   : > { %v1861_v27 = vsel %vm1813_vm6, %v2385_v53, %v1837_v60  ;;  %1928 = vmatprep.subr.bf16.mxu1 %v1871_v62  ;;  %v2373_v22 = vadd.f32 %v1660_v7, %v1470_v23  ;;  %v2374_v10 = vadd.f32 %v1662_v2, %v1470_v23  ;;  %vm1814_vm10 = vcmp.ge.f32.partialorder %v2386_v44, 0.0 }
 0x483   : > { %v1874_v25 = vpack.c.bf16 %v1861_v27, %v1857_v6  ;;  %1929 = vmatpush1.bf16.msra.mxu1 %v1870_v46  ;;  %v1848_v41 = vsel %vm1800_vm0, %v2368_v54, %v1824_v12  ;;  %v1852_v35 = vsel %vm1804_vm11, %v2370_v59, %v1828_v26  ;;  %vm1808_vm14 = vcmp.ge.f32.partialorder %v2372_v3, 0.0 }
 0x484   : > { %v1832_v17 = vmul.f32 0.2, %v2372_v3  ;;  %vm1811_vm3 = vcmp.ge.f32.partialorder %v2373_v22, 0.0  ;;  %v1835_v33 = vmul.f32 0.2, %v2373_v22  ;;  %vm1812_vm8 = vcmp.ge.f32.partialorder %v2374_v10, 0.0 }
 0x485   : > { %v1836_v5 = vmul.f32 0.2, %v2374_v10  ;;  %v1869_v18 = vpack.c.bf16 %v1852_v35, %v1848_v41  ;;  %v1855_v47 = vsel %vm1807_vm15, %v2371_v50, %v1831_v52  ;;  %v1858_v28 = vsel %vm1810_vm5, %v2384_v1, %v1834_v58 }
 0x486   : > { %v1859_v4 = vsel %vm1811_vm3, %v2373_v22, %v1835_v33  ;;  %v1862_v57 = vsel %vm1814_vm10, %v2386_v44, %v1838_v0  ;;  %v1856_v45 = vsel %vm1808_vm14, %v2372_v3, %v1832_v17 }
 0x487   : > { %v1872_v13 = vpack.c.bf16 %v1859_v4, %v1855_v47  ;;  %1887 = vmatprep.subr.bf16.mxu0 %v1869_v18  ;;  %v1875_v40 = vpack.c.bf16 %v1862_v57, %v1858_v28  ;;  %v1860_v61 = vsel %vm1812_vm8, %v2374_v10, %v1836_v5 }
 0x488   : > { %1888 = vmatpush1.bf16.msra.mxu0 %v1868_v14  ;;  %v1873_v11 = vpack.c.bf16 %v1860_v61, %v1856_v45 }
 0x489   : > { %1930 = vmatprep.subr.bf16.mxu1 %v1875_v40 }
 0x48a   : > { %1931 = vmatpush1.bf16.msra.mxu1 %v1874_v25  ;;  %1889 = vmatprep.subr.bf16.mxu0 %v1873_v11 }
 0x48c   : > { %1890 = vmatpush1.bf16.msra.mxu0 %v1872_v13 }
 0x48d   : > { %2326 = vmatmul.mubr.msk.bf16.vlgmr.msra.gmra.mrb[36].mxu1 %vm1529_vm7, %v1863_v8 }
 0x48f   : > { %2325 = vmatmul.mubr.msk.bf16.vlgmr.msra.gmra.mrb[36].mxu0 %vm1529_vm7, %v1863_v8 }
 0x560   : > { %v1960_v55 = vpop.f32.mrb[36].mxu1 }
 0x561   : > { %v1961_v54 = vadd.f32 %v1960_v55, %v1880_v16  ;;  %v1962_v38 = vpop.f32.mrb[37].mxu1 }
 0x562   : > { %v1963_v30 = vadd.f32 %v1962_v38, %v1880_v16  ;;  %v1919_v56 = vpop.f32.mrb[36].mxu0  ;;  %v1964_v20 = vpop.f32.mrb[38].mxu1 }
 0x563   : > { %v1920_v9 = vadd.f32 %v1919_v56, %v1880_v16  ;;  %v1921_v59 = vpop.f32.mrb[37].mxu0  ;;  %v1965_v46 = vpop.f32.mrb[39].mxu1 }
 0x564   : > { %v1972_v43 = vcombine.low %v1961_v54, %v1963_v30  ;;  %v1922_v29 = vadd.f32 %v1921_v59, %v1880_v16  ;;  %v1923_v63 = vpop.f32.mrb[38].mxu0 }
 0x565   : > { %v1924_v12 = vpop.f32.mrb[39].mxu0 }
 0x566   : > { %1976 = vst [vmem:[%s435_s24 + $0x8] sm:$0x77] %v1972_v43  ;;  %v1971_v24 = vcombine.low %v1920_v9, %v1922_v29 }
 0x568   : > { %1975 = vst [vmem:[%s435_s24] sm:$0x77] %v1971_v24 }
 0x569   : > { %2846 = shalt.err (!%p2843_p8)
}
 0x56a   : > { %s2847_s16 = scalar_lea.hbm %s4427_s14, 256  ;;  %s2851_s19 = scalar_lea.hbm %s4602_s4, 2048 }
 0x56b   : > { %p2848_p1 = scmp.ne.s32.totalorder %s4427_s14, %s2847_s16  ;;  %p2852_p9 = scmp.lt.u32.totalorder %s4427_s14, %s4602_s4 }
 0x56c   : > { %p2853_p12 = scmp.lt.u32.totalorder %s2851_s19, %s2847_s16  ;;  %p2855_p13 = scmp.lt.u32.totalorder %s2847_s16, %s4427_s14 }
 0x56d   : > { %p2849_p3 = pnand %p2848_p1, %p4603_p7 }
 0x56e   : > { %p2854_p11 = por %p2853_p12, %p2852_p9 }
 0x56f   : > { %p2850_p10 = pneg %p2849_p3 }
 0x570   : > { %p2856_p5 = por %p2855_p13, %p2854_p11 }
 0x572   : > { %p2857_p0 = pnand %p2856_p5, %p2850_p10 }
 0x574   : > { %2860 = shalt.err (!%p2857_p0)
}
 0x575   : > { %2445 = dma.vmem_to_hbm [thread:$0]  (%p4603_p7), %s4429_s17, 256, %s4427_s14, %s1978_s15  }
 0x576 PF: > { %p2492_p2 = scmp.ge.s32.totalorder %s2947_s12, 2  ;;  %s2006_s24 = sand.u32 1, %s2919_s27  }
 0x577   : > { %p4604_p4 = scmp.ne.s32.totalorder %s4532_s5, 0  ;;  %s2007_s25 = scalar_lea.sflag [#allocation4], %s2006_s24 }
 0x579   : > { %p2474_p6 = pnand %p2492_p2, %p4604_p4 }
 0x57b   : > { %2914 = dma.done.wait (!%p2474_p6), %s2007_s25, 256  }
 0x57c   : > { %2916 = vsyncadd (!%p2474_p6), %s2007_s25, 4294967040  ;;  %s28_s12 = sadd.s32 1, %s2947_s12   ;;  %s4605_s27 = smov %s2923_s28 }
 0x57d   : > { %p25_p8 = scmp.ge.s32.totalorder %s28_s12, 10   ;;  %s4606_s28 = smov %s2927_s29 }
 0x57e   : > { %s4607_s29 = smov %s3260_s21  ;;  %s4608_s30 = smov %s2939_s10 }
 0x57f   : > { %s4609_s9 = smov %s2943_s11  ;;  %s4610_s10 = smov %s4613_s20 }
 0x580   : > { %s4611_s11 = smov %s4617_s22  ;;  %27 = sbr.rel (!%p25_p8) target bundleno = 18 (0x12), region = 125 }
 0x587   :  { %2012 = vsyncpa [#allocation3], 1 }
 0x588   :  { %2014 = vsyncpa [#allocation3 + $0x1], 1 }
 0x589   :  { %2015 = vsyncpa [#allocation6], 1 }
 0x58a   :  { %2016 = vsyncpa [#allocation9], 1 }
 0x58b   :  { %2017 = vsyncpa [#allocation12], 1 }
 0x58c   :  { %2018 = vsyncpa [#allocation15], 1 }
 0x58d   :  { %2019 = vsyncpa [#allocation4], 1 }
 0x58e   :  { %2021 = vsyncpa [#allocation4 + $0x1], 1 }

</bundles_post_ra>
